<compile_context>
chip_gen: v6e
topology: v6e:2x2x1
jax: 0.10.0
libtpu: 0.0.40
codegen_flags: <defaults>
</compile_context>

<pallas_src>
import numpy as np
import jax
import jax.numpy as jnp
from jax import lax
from jax.experimental import pallas as pl
from jax.experimental.pallas import tpu as pltpu


# ---------------------- host-side 0/1 constant builders ----------------------

def _pool_select(B, L, K):
    """MaxPool1d(2) as one MXU matmul on the 'wide' conv-output layout.

    Rows index the wide conv output (per-batch blocks of L columns, first Lout
    valid); columns are [even picks | odd picks] in compact batch-major order,
    so pooled = max(full[:, :B*Lp], full[:, B*Lp:]).  Junk/odd-tail rows are
    all-zero, which also drops PyTorch's floor-truncated last column.
    """
    Lout = L - K + 1
    Lp = Lout // 2
    W = (B - 1) * L + Lout
    S = np.zeros((W, 2 * B * Lp), np.float32)
    for b in range(B):
        for p in range(Lp):
            S[b * L + 2 * p, b * Lp + p] = 1.0
            S[b * L + 2 * p + 1, B * Lp + b * Lp + p] = 1.0
    return S


def _handoff_mats(B, C3, L3):
    """Matrices realizing torch.reshape((B,C3,L3)->(B,L3,C3)) on the MXU.

    With a = conv3 output (C3, B*L3) batch-major along lanes:
      v = a @ gat            : v[c, b*FT + j] = a[c, b*L3 + j%L3]
      row = sum_c(v * msk)   : row[0, b*FT + j] = a[j//L3, b*L3 + j%L3]
                             = x3[b].flatten()[j]
    """
    FT = C3 * L3
    gat = np.zeros((B * L3, B * FT), np.float32)
    msk = np.zeros((C3, B * FT), np.float32)
    for b in range(B):
        for j in range(FT):
            gat[b * L3 + j % L3, b * FT + j] = 1.0
            msk[j // L3, b * FT + j] = 1.0
    return gat, msk


# -------------------------------- Pallas kernel -------------------------------

def fused_kernel(x_ref,
                 w1_ref, b1_ref, sel1_ref,
                 w2_ref, b2_ref, sel2_ref,
                 w3_ref, b3_ref, sel3_ref,
                 gat_ref, msk_ref,
                 wih_ref, whh_ref, bg_ref,
                 wfc_ref, bfc_ref,
                 out_ref):
    B = x_ref.shape[0]

    def mm(a, b):
        return jnp.dot(a, b, preferred_element_type=jnp.float32)

    # Channels-first input, batch folded along lanes (128-aligned concat).
    x_cols = jnp.concatenate([x_ref[b] for b in range(B)], axis=1)   # (Cin, B*L)
    L = x_ref.shape[2]

    def conv_block(x_cols, L, w_ref, b_ref, sel_ref):
        """Conv1d(K, VALID) + bias + ReLU + MaxPool1d(2), both batches at once."""
        Cin = x_cols.shape[0]
        w = w_ref[...]                               # (Cout, K*Cin), k-major cols
        K = w.shape[1] // Cin
        Lout = L - K + 1
        Lp = Lout // 2
        Wl = (B - 1) * L + Lout                      # 'wide' width incl. junk cols
        # One contiguous lane slice per tap covers every batch; the K taps are
        # stacked along sublanes so the whole layer is one MXU contraction.
        rhs = jnp.concatenate([x_cols[:, k:k + Wl] for k in range(K)], axis=0)
        y = jnp.maximum(mm(w, rhs) + b_ref[...], 0.0)         # (Cout, Wl)
        full = mm(y, sel_ref[...])                             # (Cout, 2*B*Lp)
        pooled = jnp.maximum(full[:, :B * Lp], full[:, B * Lp:])   # (Cout, B*Lp)
        return pooled, Lp

    a, L = conv_block(x_cols, L, w1_ref, b1_ref, sel1_ref)
    a, L = conv_block(a, L, w2_ref, b2_ref, sel2_ref)
    a, L = conv_block(a, L, w3_ref, b3_ref, sel3_ref)
    C3, L3 = a.shape[0], L
    T, F = L3, C3
    FT = C3 * L3

    # Raw reshape (B,C3,L3)->(B,L3,C3) done in-register via gather matmul + mask.
    v = mm(a, gat_ref[...])                                    # (C3, B*FT)
    row = jnp.sum(v * msk_ref[...], axis=0, keepdims=True)     # (1,  B*FT)
    flat = jnp.concatenate([row[:, b * FT:(b + 1) * FT] for b in range(B)],
                           axis=0)                             # (B, C3*L3)
    # flat[b, j] == x3[b].flatten()[j]  ->  x_resh[b, t, :] == flat[b, t*F:(t+1)*F]

    # LSTM input projections hoisted off the serial chain (list -> zero per-step
    # gather cost in the statically unrolled recurrence).
    wih = wih_ref[...]
    whh = whh_ref[...]
    bsum = bg_ref[...]
    xg = [mm(flat[:, t * F:(t + 1) * F], wih) + bsum for t in range(T)]

    H = whh.shape[0]
    h = jnp.zeros((B, H), jnp.float32)
    c = jnp.zeros((B, H), jnp.float32)
    # TODO(synk): keep W_hh resident in MXU staging regs (pltpu.matmul_push_rhs)
    # if a bundle dump shows the (H,4H) RHS being re-pushed every step.
    for t in range(T):                    # static unroll; only h @ W_hh is serial
        gates = xg[t] + mm(h, whh)
        sig = jax.nn.sigmoid(gates[:, :3 * H])      # gate order (i, f, o, g)
        i_g = sig[:, :H]
        f_g = sig[:, H:2 * H]
        o_g = sig[:, 2 * H:3 * H]
        g_g = jnp.tanh(gates[:, 3 * H:])
        c = f_g * c + i_g * g_g
        h = o_g * jnp.tanh(c)

    out_ref[...] = mm(h, wfc_ref[...]) + bfc_ref[...]


# ---------------------------------- wrapper -----------------------------------

def cnn1d_lstm_forward(X, p, hidden_size):
    B, seq_len, num_feat = X.shape
    H = hidden_size

    # torch.reshape(X, (B, num_feat, seq_len)) -- RAW reshape, NOT a transpose.
    x_bcl = X.reshape(B, num_feat, seq_len)

    def flat_w(w):                       # (Cout, Cin, K) -> (Cout, K*Cin), k-major
        Cout, Cin, K = w.shape
        return jnp.transpose(w, (0, 2, 1)).reshape(Cout, K * Cin)

    C1, _, K1 = p["w1"].shape
    C2, _, K2 = p["w2"].shape
    C3, _, K3 = p["w3"].shape
    L1 = (seq_len - K1 + 1) // 2
    L2 = (L1 - K2 + 1) // 2
    L3 = (L2 - K3 + 1) // 2

    sel1 = jnp.asarray(_pool_select(B, seq_len, K1))
    sel2 = jnp.asarray(_pool_select(B, L1, K2))
    sel3 = jnp.asarray(_pool_select(B, L2, K3))
    gat_np, msk_np = _handoff_mats(B, C3, L3)
    gat = jnp.asarray(gat_np)
    msk = jnp.asarray(msk_np)

    # LSTM weights: PyTorch gate order (i,f,g,o) -> (i,f,o,g) so one sigmoid
    # covers a contiguous 3H-lane slice; biases combined once.
    def reorder_gates(w):                # leading dim is 4H
        g4 = w.reshape(4, H, *w.shape[1:])
        return jnp.concatenate([g4[0], g4[1], g4[3], g4[2]], axis=0)

    wih_t = reorder_gates(p["w_ih"]).T                    # (C3, 4H)
    whh_t = reorder_gates(p["w_hh"]).T                    # (H, 4H)
    bsum = reorder_gates(p["b_ih"] + p["b_hh"]).reshape(1, 4 * H)
    NC = p["w_fc"].shape[0]

    operands = (
        x_bcl,
        flat_w(p["w1"]), p["b1"].reshape(C1, 1), sel1,
        flat_w(p["w2"]), p["b2"].reshape(C2, 1), sel2,
        flat_w(p["w3"]), p["b3"].reshape(C3, 1), sel3,
        gat, msk,
        wih_t, whh_t, bsum,
        p["w_fc"].T, p["b_fc"].reshape(1, NC),
    )
    in_specs = [
        pl.BlockSpec(op.shape, lambda i, _n=op.ndim: (0,) * _n)
        for op in operands
    ]

    return pl.pallas_call(
        fused_kernel,
        out_shape=jax.ShapeDtypeStruct((B, NC), jnp.float32),
        grid=(1,),
        in_specs=in_specs,
        out_specs=pl.BlockSpec((B, NC), lambda i: (0, 0)),
        compiler_params=pltpu.CompilerParams(
            dimension_semantics=("arbitrary",)),
    )(*operands)


# ---------------------------- params / reference ------------------------------

def init_params(key, input_size, hidden_size, n_classes):
    ks = jax.random.split(key, 12)
    s = 0.1
    C, H = input_size, hidden_size
    return {
        "w1": jax.random.normal(ks[0], (2 * C, C, 5), jnp.float32) * s,
        "b1": jax.random.normal(ks[1], (2 * C,), jnp.float32) * s,
        "w2": jax.random.normal(ks[2], (4 * C, 2 * C, 5), jnp.float32) * s,
        "b2": jax.random.normal(ks[3], (4 * C,), jnp.float32) * s,
        "w3": jax.random.normal(ks[4], (8 * C, 4 * C, 5), jnp.float32) * s,
        "b3": jax.random.normal(ks[5], (8 * C,), jnp.float32) * s,
        "w_ih": jax.random.normal(ks[6], (4 * H, 8 * C), jnp.float32) * s,
        "w_hh": jax.random.normal(ks[7], (4 * H, H), jnp.float32) * s,
        "b_ih": jax.random.normal(ks[8], (4 * H,), jnp.float32) * s,
        "b_hh": jax.random.normal(ks[9], (4 * H,), jnp.float32) * s,
        "w_fc": jax.random.normal(ks[10], (n_classes, H), jnp.float32) * s,
        "b_fc": jax.random.normal(ks[11], (n_classes,), jnp.float32) * s,
    }


def reference_forward(X, p, hidden_size):
    """Pure-JAX mirror of the PyTorch forward (for correctness checking)."""
    B, L, C = X.shape
    x = X.reshape(B, C, L)

    def conv_block(x_bcl, w, b):
        y = lax.conv_general_dilated(x_bcl, w, (1,), "VALID",
                                     dimension_numbers=("NCH", "OIH", "NCH"))
        y = jnp.maximum(y + b[None, :, None], 0.0)
        Lp = y.shape[2] // 2
        return y[:, :, :2 * Lp].reshape(y.shape[0], y.shape[1], Lp, 2).max(-1)

    x1 = conv_block(x, p["w1"], p["b1"])
    x2 = conv_block(x1, p["w2"], p["b2"])
    x3 = conv_block(x2, p["w3"], p["b3"])
    xr = x3.reshape(B, x3.shape[2], x3.shape[1])
    H = hidden_size
    h = jnp.zeros((B, H), jnp.float32)
    c = jnp.zeros((B, H), jnp.float32)
    for t in range(xr.shape[1]):
        g = xr[:, t] @ p["w_ih"].T + p["b_ih"] + h @ p["w_hh"].T + p["b_hh"]
        i, f, gg, o = jnp.split(g, 4, axis=1)
        i = jax.nn.sigmoid(i)
        f = jax.nn.sigmoid(f)
        gg = jnp.tanh(gg)
        o = jax.nn.sigmoid(o)
        c = f * c + i * gg
        h = o * jnp.tanh(c)
    return h @ p["w_fc"].T + p["b_fc"]


# ----------------------------------- main --------------------------------------

if __name__ == "__main__":
    input_size = 4       # "feature" size
    hidden_size = 32
    n_classes = 5
    seq_len = 128
    batch = 2

    key = jax.random.PRNGKey(0)
    kx, kp = jax.random.split(key)
    X = jax.random.normal(kx, (batch, seq_len, input_size), jnp.float32)
    params = init_params(kp, input_size, hidden_size, n_classes)

    fwd = jax.jit(cnn1d_lstm_forward, static_argnums=(2,))
    out = jax.block_until_ready(fwd(X, params, hidden_size))

    ref = jax.block_until_ready(reference_forward(X, params, hidden_size))
    assert out.shape == (batch, n_classes)
    assert jnp.allclose(out, ref, atol=1e-3, rtol=1e-3)
    print("KERNEL_OK")
</pallas_src>

<mosaic_0001>
module attributes {stable_mosaic.version = 11 : i64} {
  func.func @fused_kernel(%arg0: i32, %arg1: memref<2x4x128xf32, #tpu.memory_space<vmem>>, %arg2: memref<8x20xf32, #tpu.memory_space<vmem>>, %arg3: memref<8x1xf32, #tpu.memory_space<vmem>>, %arg4: memref<252x248xf32, #tpu.memory_space<vmem>>, %arg5: memref<16x40xf32, #tpu.memory_space<vmem>>, %arg6: memref<16x1xf32, #tpu.memory_space<vmem>>, %arg7: memref<120x116xf32, #tpu.memory_space<vmem>>, %arg8: memref<32x80xf32, #tpu.memory_space<vmem>>, %arg9: memref<32x1xf32, #tpu.memory_space<vmem>>, %arg10: memref<54x48xf32, #tpu.memory_space<vmem>>, %arg11: memref<24x768xf32, #tpu.memory_space<vmem>>, %arg12: memref<32x768xf32, #tpu.memory_space<vmem>>, %arg13: memref<32x128xf32, #tpu.memory_space<vmem>>, %arg14: memref<32x128xf32, #tpu.memory_space<vmem>>, %arg15: memref<1x128xf32, #tpu.memory_space<vmem>>, %arg16: memref<32x5xf32, #tpu.memory_space<vmem>>, %arg17: memref<1x5xf32, #tpu.memory_space<vmem>>, %arg18: memref<2x5xf32, #tpu.memory_space<vmem>>) attributes {dimension_semantics = [#tpu.dimension_semantics<arbitrary>], iteration_bounds = array<i64: 1>, scalar_prefetch = 0 : i64, scratch_operands = 0 : i64, tpu.core_type = #tpu.core_type<tc>, window_params = [{pipeline_mode = #tpu.pipeline_mode<synchronous>, transform_indices = @transform_0, window_bounds = array<i64: 2, 4, 128>}, {pipeline_mode = #tpu.pipeline_mode<synchronous>, transform_indices = @transform_1, window_bounds = array<i64: 8, 20>}, {pipeline_mode = #tpu.pipeline_mode<synchronous>, transform_indices = @transform_2, window_bounds = array<i64: 8, 1>}, {pipeline_mode = #tpu.pipeline_mode<synchronous>, transform_indices = @transform_3, window_bounds = array<i64: 252, 248>}, {pipeline_mode = #tpu.pipeline_mode<synchronous>, transform_indices = @transform_4, window_bounds = array<i64: 16, 40>}, {pipeline_mode = #tpu.pipeline_mode<synchronous>, transform_indices = @transform_5, window_bounds = array<i64: 16, 1>}, {pipeline_mode = #tpu.pipeline_mode<synchronous>, transform_indices = @transform_6, window_bounds = array<i64: 120, 116>}, {pipeline_mode = #tpu.pipeline_mode<synchronous>, transform_indices = @transform_7, window_bounds = array<i64: 32, 80>}, {pipeline_mode = #tpu.pipeline_mode<synchronous>, transform_indices = @transform_8, window_bounds = array<i64: 32, 1>}, {pipeline_mode = #tpu.pipeline_mode<synchronous>, transform_indices = @transform_9, window_bounds = array<i64: 54, 48>}, {pipeline_mode = #tpu.pipeline_mode<synchronous>, transform_indices = @transform_10, window_bounds = array<i64: 24, 768>}, {pipeline_mode = #tpu.pipeline_mode<synchronous>, transform_indices = @transform_11, window_bounds = array<i64: 32, 768>}, {pipeline_mode = #tpu.pipeline_mode<synchronous>, transform_indices = @transform_12, window_bounds = array<i64: 32, 128>}, {pipeline_mode = #tpu.pipeline_mode<synchronous>, transform_indices = @transform_13, window_bounds = array<i64: 32, 128>}, {pipeline_mode = #tpu.pipeline_mode<synchronous>, transform_indices = @transform_14, window_bounds = array<i64: 1, 128>}, {pipeline_mode = #tpu.pipeline_mode<synchronous>, transform_indices = @transform_15, window_bounds = array<i64: 32, 5>}, {pipeline_mode = #tpu.pipeline_mode<synchronous>, transform_indices = @transform_16, window_bounds = array<i64: 1, 5>}, {pipeline_mode = #tpu.pipeline_mode<synchronous>, transform_indices = @transform_17, window_bounds = array<i64: 2, 5>}]} {
    %c0 = arith.constant 0 : index
    %c0_0 = arith.constant 0 : index
    %c0_1 = arith.constant 0 : index
    %0 = vector.load %arg1[%c0, %c0_0, %c0_1] : memref<2x4x128xf32, #tpu.memory_space<vmem>>, vector<1x4x128xf32>
    %1 = vector.shape_cast %0 : vector<1x4x128xf32> to vector<4x128xf32>
    %c1 = arith.constant 1 : index
    %c0_2 = arith.constant 0 : index
    %c0_3 = arith.constant 0 : index
    %2 = vector.load %arg1[%c1, %c0_2, %c0_3] : memref<2x4x128xf32, #tpu.memory_space<vmem>>, vector<1x4x128xf32>
    %3 = vector.shape_cast %2 : vector<1x4x128xf32> to vector<4x128xf32>
    %4 = tpu.concatenate %1, %3 in 1 : vector<4x128xf32>, vector<4x128xf32> -> vector<4x256xf32>
    %c0_4 = arith.constant 0 : index
    %c0_5 = arith.constant 0 : index
    %5 = vector.load %arg2[%c0_4, %c0_5] : memref<8x20xf32, #tpu.memory_space<vmem>>, vector<8x20xf32>
    %6 = vector.extract_strided_slice %4 {offsets = [0, 0], sizes = [4, 252], strides = [1, 1]} : vector<4x256xf32> to vector<4x252xf32>
    %7 = vector.extract_strided_slice %4 {offsets = [0, 1], sizes = [4, 252], strides = [1, 1]} : vector<4x256xf32> to vector<4x252xf32>
    %8 = vector.extract_strided_slice %4 {offsets = [0, 2], sizes = [4, 252], strides = [1, 1]} : vector<4x256xf32> to vector<4x252xf32>
    %9 = vector.extract_strided_slice %4 {offsets = [0, 3], sizes = [4, 252], strides = [1, 1]} : vector<4x256xf32> to vector<4x252xf32>
    %10 = vector.extract_strided_slice %4 {offsets = [0, 4], sizes = [4, 252], strides = [1, 1]} : vector<4x256xf32> to vector<4x252xf32>
    %11 = tpu.concatenate %6, %7, %8, %9, %10 in 0 : vector<4x252xf32>, vector<4x252xf32>, vector<4x252xf32>, vector<4x252xf32>, vector<4x252xf32> -> vector<20x252xf32>
    %cst = arith.constant dense<0.000000e+00> : vector<8x252xf32>
    %12 = tpu.matmul %5, %11, %cst {dimension_numbers = #tpu.dot_dimension_numbers<[1], [0], [0], [1], [0, 0, 1, 1], [], []>} : vector<8x20xf32>, vector<20x252xf32>, vector<8x252xf32> -> vector<8x252xf32>
    %c0_6 = arith.constant 0 : index
    %c0_7 = arith.constant 0 : index
    %13 = vector.load %arg3[%c0_6, %c0_7] : memref<8x1xf32, #tpu.memory_space<vmem>>, vector<8x1xf32>
    %14 = vector.broadcast %13 : vector<8x1xf32> to vector<8x252xf32>
    %15 = arith.addf %12, %14 : vector<8x252xf32>
    %cst_8 = arith.constant 0.000000e+00 : f32
    %16 = vector.broadcast %cst_8 : f32 to vector<8x252xf32>
    %17 = arith.maximumf %15, %16 : vector<8x252xf32>
    %c0_9 = arith.constant 0 : index
    %c0_10 = arith.constant 0 : index
    %18 = vector.load %arg4[%c0_9, %c0_10] : memref<252x248xf32, #tpu.memory_space<vmem>>, vector<252x248xf32>
    %cst_11 = arith.constant dense<0.000000e+00> : vector<8x248xf32>
    %19 = tpu.matmul %17, %18, %cst_11 {dimension_numbers = #tpu.dot_dimension_numbers<[1], [0], [0], [1], [0, 0, 1, 1], [], []>} : vector<8x252xf32>, vector<252x248xf32>, vector<8x248xf32> -> vector<8x248xf32>
    %20 = vector.extract_strided_slice %19 {offsets = [0, 0], sizes = [8, 124], strides = [1, 1]} : vector<8x248xf32> to vector<8x124xf32>
    %21 = vector.extract_strided_slice %19 {offsets = [0, 124], sizes = [8, 124], strides = [1, 1]} : vector<8x248xf32> to vector<8x124xf32>
    %22 = arith.maximumf %20, %21 : vector<8x124xf32>
    %c0_12 = arith.constant 0 : index
    %c0_13 = arith.constant 0 : index
    %23 = vector.load %arg5[%c0_12, %c0_13] : memref<16x40xf32, #tpu.memory_space<vmem>>, vector<16x40xf32>
    %24 = vector.extract_strided_slice %22 {offsets = [0, 0], sizes = [8, 120], strides = [1, 1]} : vector<8x124xf32> to vector<8x120xf32>
    %25 = vector.extract_strided_slice %22 {offsets = [0, 1], sizes = [8, 120], strides = [1, 1]} : vector<8x124xf32> to vector<8x120xf32>
    %26 = vector.extract_strided_slice %22 {offsets = [0, 2], sizes = [8, 120], strides = [1, 1]} : vector<8x124xf32> to vector<8x120xf32>
    %27 = vector.extract_strided_slice %22 {offsets = [0, 3], sizes = [8, 120], strides = [1, 1]} : vector<8x124xf32> to vector<8x120xf32>
    %28 = vector.extract_strided_slice %22 {offsets = [0, 4], sizes = [8, 120], strides = [1, 1]} : vector<8x124xf32> to vector<8x120xf32>
    %29 = tpu.concatenate %24, %25, %26, %27, %28 in 0 : vector<8x120xf32>, vector<8x120xf32>, vector<8x120xf32>, vector<8x120xf32>, vector<8x120xf32> -> vector<40x120xf32>
    %cst_14 = arith.constant dense<0.000000e+00> : vector<16x120xf32>
    %30 = tpu.matmul %23, %29, %cst_14 {dimension_numbers = #tpu.dot_dimension_numbers<[1], [0], [0], [1], [0, 0, 1, 1], [], []>} : vector<16x40xf32>, vector<40x120xf32>, vector<16x120xf32> -> vector<16x120xf32>
    %c0_15 = arith.constant 0 : index
    %c0_16 = arith.constant 0 : index
    %31 = vector.load %arg6[%c0_15, %c0_16] : memref<16x1xf32, #tpu.memory_space<vmem>>, vector<16x1xf32>
    %32 = vector.broadcast %31 : vector<16x1xf32> to vector<16x120xf32>
    %33 = arith.addf %30, %32 : vector<16x120xf32>
    %cst_17 = arith.constant 0.000000e+00 : f32
    %34 = vector.broadcast %cst_17 : f32 to vector<16x120xf32>
    %35 = arith.maximumf %33, %34 : vector<16x120xf32>
    %c0_18 = arith.constant 0 : index
    %c0_19 = arith.constant 0 : index
    %36 = vector.load %arg7[%c0_18, %c0_19] : memref<120x116xf32, #tpu.memory_space<vmem>>, vector<120x116xf32>
    %cst_20 = arith.constant dense<0.000000e+00> : vector<16x116xf32>
    %37 = tpu.matmul %35, %36, %cst_20 {dimension_numbers = #tpu.dot_dimension_numbers<[1], [0], [0], [1], [0, 0, 1, 1], [], []>} : vector<16x120xf32>, vector<120x116xf32>, vector<16x116xf32> -> vector<16x116xf32>
    %38 = vector.extract_strided_slice %37 {offsets = [0, 0], sizes = [16, 58], strides = [1, 1]} : vector<16x116xf32> to vector<16x58xf32>
    %39 = vector.extract_strided_slice %37 {offsets = [0, 58], sizes = [16, 58], strides = [1, 1]} : vector<16x116xf32> to vector<16x58xf32>
    %40 = arith.maximumf %38, %39 : vector<16x58xf32>
    %c0_21 = arith.constant 0 : index
    %c0_22 = arith.constant 0 : index
    %41 = vector.load %arg8[%c0_21, %c0_22] : memref<32x80xf32, #tpu.memory_space<vmem>>, vector<32x80xf32>
    %42 = vector.extract_strided_slice %40 {offsets = [0, 0], sizes = [16, 54], strides = [1, 1]} : vector<16x58xf32> to vector<16x54xf32>
    %43 = vector.extract_strided_slice %40 {offsets = [0, 1], sizes = [16, 54], strides = [1, 1]} : vector<16x58xf32> to vector<16x54xf32>
    %44 = vector.extract_strided_slice %40 {offsets = [0, 2], sizes = [16, 54], strides = [1, 1]} : vector<16x58xf32> to vector<16x54xf32>
    %45 = vector.extract_strided_slice %40 {offsets = [0, 3], sizes = [16, 54], strides = [1, 1]} : vector<16x58xf32> to vector<16x54xf32>
    %46 = vector.extract_strided_slice %40 {offsets = [0, 4], sizes = [16, 54], strides = [1, 1]} : vector<16x58xf32> to vector<16x54xf32>
    %47 = tpu.concatenate %42, %43, %44, %45, %46 in 0 : vector<16x54xf32>, vector<16x54xf32>, vector<16x54xf32>, vector<16x54xf32>, vector<16x54xf32> -> vector<80x54xf32>
    %cst_23 = arith.constant dense<0.000000e+00> : vector<32x54xf32>
    %48 = tpu.matmul %41, %47, %cst_23 {dimension_numbers = #tpu.dot_dimension_numbers<[1], [0], [0], [1], [0, 0, 1, 1], [], []>} : vector<32x80xf32>, vector<80x54xf32>, vector<32x54xf32> -> vector<32x54xf32>
    %c0_24 = arith.constant 0 : index
    %c0_25 = arith.constant 0 : index
    %49 = vector.load %arg9[%c0_24, %c0_25] : memref<32x1xf32, #tpu.memory_space<vmem>>, vector<32x1xf32>
    %50 = vector.broadcast %49 : vector<32x1xf32> to vector<32x54xf32>
    %51 = arith.addf %48, %50 : vector<32x54xf32>
    %cst_26 = arith.constant 0.000000e+00 : f32
    %52 = vector.broadcast %cst_26 : f32 to vector<32x54xf32>
    %53 = arith.maximumf %51, %52 : vector<32x54xf32>
    %c0_27 = arith.constant 0 : index
    %c0_28 = arith.constant 0 : index
    %54 = vector.load %arg10[%c0_27, %c0_28] : memref<54x48xf32, #tpu.memory_space<vmem>>, vector<54x48xf32>
    %cst_29 = arith.constant dense<0.000000e+00> : vector<32x48xf32>
    %55 = tpu.matmul %53, %54, %cst_29 {dimension_numbers = #tpu.dot_dimension_numbers<[1], [0], [0], [1], [0, 0, 1, 1], [], []>} : vector<32x54xf32>, vector<54x48xf32>, vector<32x48xf32> -> vector<32x48xf32>
    %56 = vector.extract_strided_slice %55 {offsets = [0, 0], sizes = [32, 24], strides = [1, 1]} : vector<32x48xf32> to vector<32x24xf32>
    %57 = vector.extract_strided_slice %55 {offsets = [0, 24], sizes = [32, 24], strides = [1, 1]} : vector<32x48xf32> to vector<32x24xf32>
    %58 = arith.maximumf %56, %57 : vector<32x24xf32>
    %c0_30 = arith.constant 0 : index
    %c0_31 = arith.constant 0 : index
    %59 = vector.load %arg11[%c0_30, %c0_31] : memref<24x768xf32, #tpu.memory_space<vmem>>, vector<24x768xf32>
    %cst_32 = arith.constant dense<0.000000e+00> : vector<32x768xf32>
    %60 = tpu.matmul %58, %59, %cst_32 {dimension_numbers = #tpu.dot_dimension_numbers<[1], [0], [0], [1], [0, 0, 1, 1], [], []>} : vector<32x24xf32>, vector<24x768xf32>, vector<32x768xf32> -> vector<32x768xf32>
    %c0_33 = arith.constant 0 : index
    %c0_34 = arith.constant 0 : index
    %61 = vector.load %arg12[%c0_33, %c0_34] : memref<32x768xf32, #tpu.memory_space<vmem>>, vector<32x768xf32>
    %62 = arith.mulf %60, %61 : vector<32x768xf32>
    %cst_35 = arith.constant dense<0.000000e+00> : vector<768xf32>
    %63 = vector.multi_reduction <add>, %62, %cst_35 [0] : vector<32x768xf32> to vector<768xf32>
    %64 = vector.shape_cast %63 : vector<768xf32> to vector<1x768xf32>
    %65 = vector.extract_strided_slice %64 {offsets = [0, 0], sizes = [1, 384], strides = [1, 1]} : vector<1x768xf32> to vector<1x384xf32>
    %66 = vector.extract_strided_slice %64 {offsets = [0, 384], sizes = [1, 384], strides = [1, 1]} : vector<1x768xf32> to vector<1x384xf32>
    %67 = tpu.concatenate %65, %66 in 0 : vector<1x384xf32>, vector<1x384xf32> -> vector<2x384xf32>
    %c0_36 = arith.constant 0 : index
    %c0_37 = arith.constant 0 : index
    %68 = vector.load %arg13[%c0_36, %c0_37] : memref<32x128xf32, #tpu.memory_space<vmem>>, vector<32x128xf32>
    %c0_38 = arith.constant 0 : index
    %c0_39 = arith.constant 0 : index
    %69 = vector.load %arg14[%c0_38, %c0_39] : memref<32x128xf32, #tpu.memory_space<vmem>>, vector<32x128xf32>
    %c0_40 = arith.constant 0 : index
    %c0_41 = arith.constant 0 : index
    %70 = vector.load %arg15[%c0_40, %c0_41] : memref<1x128xf32, #tpu.memory_space<vmem>>, vector<1x128xf32>
    %71 = vector.extract_strided_slice %67 {offsets = [0, 0], sizes = [2, 32], strides = [1, 1]} : vector<2x384xf32> to vector<2x32xf32>
    %cst_42 = arith.constant dense<0.000000e+00> : vector<2x128xf32>
    %72 = tpu.matmul %71, %68, %cst_42 {dimension_numbers = #tpu.dot_dimension_numbers<[1], [0], [0], [1], [0, 0, 1, 1], [], []>} : vector<2x32xf32>, vector<32x128xf32>, vector<2x128xf32> -> vector<2x128xf32>
    %73 = vector.broadcast %70 : vector<1x128xf32> to vector<2x128xf32>
    %74 = arith.addf %72, %73 : vector<2x128xf32>
    %75 = vector.extract_strided_slice %67 {offsets = [0, 32], sizes = [2, 32], strides = [1, 1]} : vector<2x384xf32> to vector<2x32xf32>
    %cst_43 = arith.constant dense<0.000000e+00> : vector<2x128xf32>
    %76 = tpu.matmul %75, %68, %cst_43 {dimension_numbers = #tpu.dot_dimension_numbers<[1], [0], [0], [1], [0, 0, 1, 1], [], []>} : vector<2x32xf32>, vector<32x128xf32>, vector<2x128xf32> -> vector<2x128xf32>
    %77 = vector.broadcast %70 : vector<1x128xf32> to vector<2x128xf32>
    %78 = arith.addf %76, %77 : vector<2x128xf32>
    %79 = vector.extract_strided_slice %67 {offsets = [0, 64], sizes = [2, 32], strides = [1, 1]} : vector<2x384xf32> to vector<2x32xf32>
    %cst_44 = arith.constant dense<0.000000e+00> : vector<2x128xf32>
    %80 = tpu.matmul %79, %68, %cst_44 {dimension_numbers = #tpu.dot_dimension_numbers<[1], [0], [0], [1], [0, 0, 1, 1], [], []>} : vector<2x32xf32>, vector<32x128xf32>, vector<2x128xf32> -> vector<2x128xf32>
    %81 = vector.broadcast %70 : vector<1x128xf32> to vector<2x128xf32>
    %82 = arith.addf %80, %81 : vector<2x128xf32>
    %83 = vector.extract_strided_slice %67 {offsets = [0, 96], sizes = [2, 32], strides = [1, 1]} : vector<2x384xf32> to vector<2x32xf32>
    %cst_45 = arith.constant dense<0.000000e+00> : vector<2x128xf32>
    %84 = tpu.matmul %83, %68, %cst_45 {dimension_numbers = #tpu.dot_dimension_numbers<[1], [0], [0], [1], [0, 0, 1, 1], [], []>} : vector<2x32xf32>, vector<32x128xf32>, vector<2x128xf32> -> vector<2x128xf32>
    %85 = vector.broadcast %70 : vector<1x128xf32> to vector<2x128xf32>
    %86 = arith.addf %84, %85 : vector<2x128xf32>
    %87 = vector.extract_strided_slice %67 {offsets = [0, 128], sizes = [2, 32], strides = [1, 1]} : vector<2x384xf32> to vector<2x32xf32>
    %cst_46 = arith.constant dense<0.000000e+00> : vector<2x128xf32>
    %88 = tpu.matmul %87, %68, %cst_46 {dimension_numbers = #tpu.dot_dimension_numbers<[1], [0], [0], [1], [0, 0, 1, 1], [], []>} : vector<2x32xf32>, vector<32x128xf32>, vector<2x128xf32> -> vector<2x128xf32>
    %89 = vector.broadcast %70 : vector<1x128xf32> to vector<2x128xf32>
    %90 = arith.addf %88, %89 : vector<2x128xf32>
    %91 = vector.extract_strided_slice %67 {offsets = [0, 160], sizes = [2, 32], strides = [1, 1]} : vector<2x384xf32> to vector<2x32xf32>
    %cst_47 = arith.constant dense<0.000000e+00> : vector<2x128xf32>
    %92 = tpu.matmul %91, %68, %cst_47 {dimension_numbers = #tpu.dot_dimension_numbers<[1], [0], [0], [1], [0, 0, 1, 1], [], []>} : vector<2x32xf32>, vector<32x128xf32>, vector<2x128xf32> -> vector<2x128xf32>
    %93 = vector.broadcast %70 : vector<1x128xf32> to vector<2x128xf32>
    %94 = arith.addf %92, %93 : vector<2x128xf32>
    %95 = vector.extract_strided_slice %67 {offsets = [0, 192], sizes = [2, 32], strides = [1, 1]} : vector<2x384xf32> to vector<2x32xf32>
    %cst_48 = arith.constant dense<0.000000e+00> : vector<2x128xf32>
    %96 = tpu.matmul %95, %68, %cst_48 {dimension_numbers = #tpu.dot_dimension_numbers<[1], [0], [0], [1], [0, 0, 1, 1], [], []>} : vector<2x32xf32>, vector<32x128xf32>, vector<2x128xf32> -> vector<2x128xf32>
    %97 = vector.broadcast %70 : vector<1x128xf32> to vector<2x128xf32>
    %98 = arith.addf %96, %97 : vector<2x128xf32>
    %99 = vector.extract_strided_slice %67 {offsets = [0, 224], sizes = [2, 32], strides = [1, 1]} : vector<2x384xf32> to vector<2x32xf32>
    %cst_49 = arith.constant dense<0.000000e+00> : vector<2x128xf32>
    %100 = tpu.matmul %99, %68, %cst_49 {dimension_numbers = #tpu.dot_dimension_numbers<[1], [0], [0], [1], [0, 0, 1, 1], [], []>} : vector<2x32xf32>, vector<32x128xf32>, vector<2x128xf32> -> vector<2x128xf32>
    %101 = vector.broadcast %70 : vector<1x128xf32> to vector<2x128xf32>
    %102 = arith.addf %100, %101 : vector<2x128xf32>
    %103 = vector.extract_strided_slice %67 {offsets = [0, 256], sizes = [2, 32], strides = [1, 1]} : vector<2x384xf32> to vector<2x32xf32>
    %cst_50 = arith.constant dense<0.000000e+00> : vector<2x128xf32>
    %104 = tpu.matmul %103, %68, %cst_50 {dimension_numbers = #tpu.dot_dimension_numbers<[1], [0], [0], [1], [0, 0, 1, 1], [], []>} : vector<2x32xf32>, vector<32x128xf32>, vector<2x128xf32> -> vector<2x128xf32>
    %105 = vector.broadcast %70 : vector<1x128xf32> to vector<2x128xf32>
    %106 = arith.addf %104, %105 : vector<2x128xf32>
    %107 = vector.extract_strided_slice %67 {offsets = [0, 288], sizes = [2, 32], strides = [1, 1]} : vector<2x384xf32> to vector<2x32xf32>
    %cst_51 = arith.constant dense<0.000000e+00> : vector<2x128xf32>
    %108 = tpu.matmul %107, %68, %cst_51 {dimension_numbers = #tpu.dot_dimension_numbers<[1], [0], [0], [1], [0, 0, 1, 1], [], []>} : vector<2x32xf32>, vector<32x128xf32>, vector<2x128xf32> -> vector<2x128xf32>
    %109 = vector.broadcast %70 : vector<1x128xf32> to vector<2x128xf32>
    %110 = arith.addf %108, %109 : vector<2x128xf32>
    %111 = vector.extract_strided_slice %67 {offsets = [0, 320], sizes = [2, 32], strides = [1, 1]} : vector<2x384xf32> to vector<2x32xf32>
    %cst_52 = arith.constant dense<0.000000e+00> : vector<2x128xf32>
    %112 = tpu.matmul %111, %68, %cst_52 {dimension_numbers = #tpu.dot_dimension_numbers<[1], [0], [0], [1], [0, 0, 1, 1], [], []>} : vector<2x32xf32>, vector<32x128xf32>, vector<2x128xf32> -> vector<2x128xf32>
    %113 = vector.broadcast %70 : vector<1x128xf32> to vector<2x128xf32>
    %114 = arith.addf %112, %113 : vector<2x128xf32>
    %115 = vector.extract_strided_slice %67 {offsets = [0, 352], sizes = [2, 32], strides = [1, 1]} : vector<2x384xf32> to vector<2x32xf32>
    %cst_53 = arith.constant dense<0.000000e+00> : vector<2x128xf32>
    %116 = tpu.matmul %115, %68, %cst_53 {dimension_numbers = #tpu.dot_dimension_numbers<[1], [0], [0], [1], [0, 0, 1, 1], [], []>} : vector<2x32xf32>, vector<32x128xf32>, vector<2x128xf32> -> vector<2x128xf32>
    %117 = vector.broadcast %70 : vector<1x128xf32> to vector<2x128xf32>
    %118 = arith.addf %116, %117 : vector<2x128xf32>
    %cst_54 = arith.constant 0.000000e+00 : f32
    %119 = vector.broadcast %cst_54 : f32 to vector<2x32xf32>
    %cst_55 = arith.constant 0.000000e+00 : f32
    %120 = vector.broadcast %cst_55 : f32 to vector<2x32xf32>
    %cst_56 = arith.constant dense<0.000000e+00> : vector<2x128xf32>
    %121 = tpu.matmul %119, %69, %cst_56 {dimension_numbers = #tpu.dot_dimension_numbers<[1], [0], [0], [1], [0, 0, 1, 1], [], []>} : vector<2x32xf32>, vector<32x128xf32>, vector<2x128xf32> -> vector<2x128xf32>
    %122 = arith.addf %74, %121 : vector<2x128xf32>
    %123 = vector.extract_strided_slice %122 {offsets = [0, 0], sizes = [2, 96], strides = [1, 1]} : vector<2x128xf32> to vector<2x96xf32>
    %124 = arith.negf %123 : vector<2x96xf32>
    %125 = math.exp %124 : vector<2x96xf32>
    %cst_57 = arith.constant 1.000000e+00 : f32
    %126 = vector.broadcast %cst_57 : f32 to vector<2x96xf32>
    %127 = arith.addf %126, %125 : vector<2x96xf32>
    %128 = arith.divf %126, %127 : vector<2x96xf32>
    %129 = vector.extract_strided_slice %128 {offsets = [0, 0], sizes = [2, 32], strides = [1, 1]} : vector<2x96xf32> to vector<2x32xf32>
    %130 = vector.extract_strided_slice %128 {offsets = [0, 32], sizes = [2, 32], strides = [1, 1]} : vector<2x96xf32> to vector<2x32xf32>
    %131 = vector.extract_strided_slice %128 {offsets = [0, 64], sizes = [2, 32], strides = [1, 1]} : vector<2x96xf32> to vector<2x32xf32>
    %132 = vector.extract_strided_slice %122 {offsets = [0, 96], sizes = [2, 32], strides = [1, 1]} : vector<2x128xf32> to vector<2x32xf32>
    %133 = math.tanh %132 : vector<2x32xf32>
    %134 = arith.mulf %130, %120 : vector<2x32xf32>
    %135 = arith.mulf %129, %133 : vector<2x32xf32>
    %136 = arith.addf %134, %135 : vector<2x32xf32>
    %137 = math.tanh %136 : vector<2x32xf32>
    %138 = arith.mulf %131, %137 : vector<2x32xf32>
    %cst_58 = arith.constant dense<0.000000e+00> : vector<2x128xf32>
    %139 = tpu.matmul %138, %69, %cst_58 {dimension_numbers = #tpu.dot_dimension_numbers<[1], [0], [0], [1], [0, 0, 1, 1], [], []>} : vector<2x32xf32>, vector<32x128xf32>, vector<2x128xf32> -> vector<2x128xf32>
    %140 = arith.addf %78, %139 : vector<2x128xf32>
    %141 = vector.extract_strided_slice %140 {offsets = [0, 0], sizes = [2, 96], strides = [1, 1]} : vector<2x128xf32> to vector<2x96xf32>
    %142 = arith.negf %141 : vector<2x96xf32>
    %143 = math.exp %142 : vector<2x96xf32>
    %cst_59 = arith.constant 1.000000e+00 : f32
    %144 = vector.broadcast %cst_59 : f32 to vector<2x96xf32>
    %145 = arith.addf %144, %143 : vector<2x96xf32>
    %146 = arith.divf %144, %145 : vector<2x96xf32>
    %147 = vector.extract_strided_slice %146 {offsets = [0, 0], sizes = [2, 32], strides = [1, 1]} : vector<2x96xf32> to vector<2x32xf32>
    %148 = vector.extract_strided_slice %146 {offsets = [0, 32], sizes = [2, 32], strides = [1, 1]} : vector<2x96xf32> to vector<2x32xf32>
    %149 = vector.extract_strided_slice %146 {offsets = [0, 64], sizes = [2, 32], strides = [1, 1]} : vector<2x96xf32> to vector<2x32xf32>
    %150 = vector.extract_strided_slice %140 {offsets = [0, 96], sizes = [2, 32], strides = [1, 1]} : vector<2x128xf32> to vector<2x32xf32>
    %151 = math.tanh %150 : vector<2x32xf32>
    %152 = arith.mulf %148, %136 : vector<2x32xf32>
    %153 = arith.mulf %147, %151 : vector<2x32xf32>
    %154 = arith.addf %152, %153 : vector<2x32xf32>
    %155 = math.tanh %154 : vector<2x32xf32>
    %156 = arith.mulf %149, %155 : vector<2x32xf32>
    %cst_60 = arith.constant dense<0.000000e+00> : vector<2x128xf32>
    %157 = tpu.matmul %156, %69, %cst_60 {dimension_numbers = #tpu.dot_dimension_numbers<[1], [0], [0], [1], [0, 0, 1, 1], [], []>} : vector<2x32xf32>, vector<32x128xf32>, vector<2x128xf32> -> vector<2x128xf32>
    %158 = arith.addf %82, %157 : vector<2x128xf32>
    %159 = vector.extract_strided_slice %158 {offsets = [0, 0], sizes = [2, 96], strides = [1, 1]} : vector<2x128xf32> to vector<2x96xf32>
    %160 = arith.negf %159 : vector<2x96xf32>
    %161 = math.exp %160 : vector<2x96xf32>
    %cst_61 = arith.constant 1.000000e+00 : f32
    %162 = vector.broadcast %cst_61 : f32 to vector<2x96xf32>
    %163 = arith.addf %162, %161 : vector<2x96xf32>
    %164 = arith.divf %162, %163 : vector<2x96xf32>
    %165 = vector.extract_strided_slice %164 {offsets = [0, 0], sizes = [2, 32], strides = [1, 1]} : vector<2x96xf32> to vector<2x32xf32>
    %166 = vector.extract_strided_slice %164 {offsets = [0, 32], sizes = [2, 32], strides = [1, 1]} : vector<2x96xf32> to vector<2x32xf32>
    %167 = vector.extract_strided_slice %164 {offsets = [0, 64], sizes = [2, 32], strides = [1, 1]} : vector<2x96xf32> to vector<2x32xf32>
    %168 = vector.extract_strided_slice %158 {offsets = [0, 96], sizes = [2, 32], strides = [1, 1]} : vector<2x128xf32> to vector<2x32xf32>
    %169 = math.tanh %168 : vector<2x32xf32>
    %170 = arith.mulf %166, %154 : vector<2x32xf32>
    %171 = arith.mulf %165, %169 : vector<2x32xf32>
    %172 = arith.addf %170, %171 : vector<2x32xf32>
    %173 = math.tanh %172 : vector<2x32xf32>
    %174 = arith.mulf %167, %173 : vector<2x32xf32>
    %cst_62 = arith.constant dense<0.000000e+00> : vector<2x128xf32>
    %175 = tpu.matmul %174, %69, %cst_62 {dimension_numbers = #tpu.dot_dimension_numbers<[1], [0], [0], [1], [0, 0, 1, 1], [], []>} : vector<2x32xf32>, vector<32x128xf32>, vector<2x128xf32> -> vector<2x128xf32>
    %176 = arith.addf %86, %175 : vector<2x128xf32>
    %177 = vector.extract_strided_slice %176 {offsets = [0, 0], sizes = [2, 96], strides = [1, 1]} : vector<2x128xf32> to vector<2x96xf32>
    %178 = arith.negf %177 : vector<2x96xf32>
    %179 = math.exp %178 : vector<2x96xf32>
    %cst_63 = arith.constant 1.000000e+00 : f32
    %180 = vector.broadcast %cst_63 : f32 to vector<2x96xf32>
    %181 = arith.addf %180, %179 : vector<2x96xf32>
    %182 = arith.divf %180, %181 : vector<2x96xf32>
    %183 = vector.extract_strided_slice %182 {offsets = [0, 0], sizes = [2, 32], strides = [1, 1]} : vector<2x96xf32> to vector<2x32xf32>
    %184 = vector.extract_strided_slice %182 {offsets = [0, 32], sizes = [2, 32], strides = [1, 1]} : vector<2x96xf32> to vector<2x32xf32>
    %185 = vector.extract_strided_slice %182 {offsets = [0, 64], sizes = [2, 32], strides = [1, 1]} : vector<2x96xf32> to vector<2x32xf32>
    %186 = vector.extract_strided_slice %176 {offsets = [0, 96], sizes = [2, 32], strides = [1, 1]} : vector<2x128xf32> to vector<2x32xf32>
    %187 = math.tanh %186 : vector<2x32xf32>
    %188 = arith.mulf %184, %172 : vector<2x32xf32>
    %189 = arith.mulf %183, %187 : vector<2x32xf32>
    %190 = arith.addf %188, %189 : vector<2x32xf32>
    %191 = math.tanh %190 : vector<2x32xf32>
    %192 = arith.mulf %185, %191 : vector<2x32xf32>
    %cst_64 = arith.constant dense<0.000000e+00> : vector<2x128xf32>
    %193 = tpu.matmul %192, %69, %cst_64 {dimension_numbers = #tpu.dot_dimension_numbers<[1], [0], [0], [1], [0, 0, 1, 1], [], []>} : vector<2x32xf32>, vector<32x128xf32>, vector<2x128xf32> -> vector<2x128xf32>
    %194 = arith.addf %90, %193 : vector<2x128xf32>
    %195 = vector.extract_strided_slice %194 {offsets = [0, 0], sizes = [2, 96], strides = [1, 1]} : vector<2x128xf32> to vector<2x96xf32>
    %196 = arith.negf %195 : vector<2x96xf32>
    %197 = math.exp %196 : vector<2x96xf32>
    %cst_65 = arith.constant 1.000000e+00 : f32
    %198 = vector.broadcast %cst_65 : f32 to vector<2x96xf32>
    %199 = arith.addf %198, %197 : vector<2x96xf32>
    %200 = arith.divf %198, %199 : vector<2x96xf32>
    %201 = vector.extract_strided_slice %200 {offsets = [0, 0], sizes = [2, 32], strides = [1, 1]} : vector<2x96xf32> to vector<2x32xf32>
    %202 = vector.extract_strided_slice %200 {offsets = [0, 32], sizes = [2, 32], strides = [1, 1]} : vector<2x96xf32> to vector<2x32xf32>
    %203 = vector.extract_strided_slice %200 {offsets = [0, 64], sizes = [2, 32], strides = [1, 1]} : vector<2x96xf32> to vector<2x32xf32>
    %204 = vector.extract_strided_slice %194 {offsets = [0, 96], sizes = [2, 32], strides = [1, 1]} : vector<2x128xf32> to vector<2x32xf32>
    %205 = math.tanh %204 : vector<2x32xf32>
    %206 = arith.mulf %202, %190 : vector<2x32xf32>
    %207 = arith.mulf %201, %205 : vector<2x32xf32>
    %208 = arith.addf %206, %207 : vector<2x32xf32>
    %209 = math.tanh %208 : vector<2x32xf32>
    %210 = arith.mulf %203, %209 : vector<2x32xf32>
    %cst_66 = arith.constant dense<0.000000e+00> : vector<2x128xf32>
    %211 = tpu.matmul %210, %69, %cst_66 {dimension_numbers = #tpu.dot_dimension_numbers<[1], [0], [0], [1], [0, 0, 1, 1], [], []>} : vector<2x32xf32>, vector<32x128xf32>, vector<2x128xf32> -> vector<2x128xf32>
    %212 = arith.addf %94, %211 : vector<2x128xf32>
    %213 = vector.extract_strided_slice %212 {offsets = [0, 0], sizes = [2, 96], strides = [1, 1]} : vector<2x128xf32> to vector<2x96xf32>
    %214 = arith.negf %213 : vector<2x96xf32>
    %215 = math.exp %214 : vector<2x96xf32>
    %cst_67 = arith.constant 1.000000e+00 : f32
    %216 = vector.broadcast %cst_67 : f32 to vector<2x96xf32>
    %217 = arith.addf %216, %215 : vector<2x96xf32>
    %218 = arith.divf %216, %217 : vector<2x96xf32>
    %219 = vector.extract_strided_slice %218 {offsets = [0, 0], sizes = [2, 32], strides = [1, 1]} : vector<2x96xf32> to vector<2x32xf32>
    %220 = vector.extract_strided_slice %218 {offsets = [0, 32], sizes = [2, 32], strides = [1, 1]} : vector<2x96xf32> to vector<2x32xf32>
    %221 = vector.extract_strided_slice %218 {offsets = [0, 64], sizes = [2, 32], strides = [1, 1]} : vector<2x96xf32> to vector<2x32xf32>
    %222 = vector.extract_strided_slice %212 {offsets = [0, 96], sizes = [2, 32], strides = [1, 1]} : vector<2x128xf32> to vector<2x32xf32>
    %223 = math.tanh %222 : vector<2x32xf32>
    %224 = arith.mulf %220, %208 : vector<2x32xf32>
    %225 = arith.mulf %219, %223 : vector<2x32xf32>
    %226 = arith.addf %224, %225 : vector<2x32xf32>
    %227 = math.tanh %226 : vector<2x32xf32>
    %228 = arith.mulf %221, %227 : vector<2x32xf32>
    %cst_68 = arith.constant dense<0.000000e+00> : vector<2x128xf32>
    %229 = tpu.matmul %228, %69, %cst_68 {dimension_numbers = #tpu.dot_dimension_numbers<[1], [0], [0], [1], [0, 0, 1, 1], [], []>} : vector<2x32xf32>, vector<32x128xf32>, vector<2x128xf32> -> vector<2x128xf32>
    %230 = arith.addf %98, %229 : vector<2x128xf32>
    %231 = vector.extract_strided_slice %230 {offsets = [0, 0], sizes = [2, 96], strides = [1, 1]} : vector<2x128xf32> to vector<2x96xf32>
    %232 = arith.negf %231 : vector<2x96xf32>
    %233 = math.exp %232 : vector<2x96xf32>
    %cst_69 = arith.constant 1.000000e+00 : f32
    %234 = vector.broadcast %cst_69 : f32 to vector<2x96xf32>
    %235 = arith.addf %234, %233 : vector<2x96xf32>
    %236 = arith.divf %234, %235 : vector<2x96xf32>
    %237 = vector.extract_strided_slice %236 {offsets = [0, 0], sizes = [2, 32], strides = [1, 1]} : vector<2x96xf32> to vector<2x32xf32>
    %238 = vector.extract_strided_slice %236 {offsets = [0, 32], sizes = [2, 32], strides = [1, 1]} : vector<2x96xf32> to vector<2x32xf32>
    %239 = vector.extract_strided_slice %236 {offsets = [0, 64], sizes = [2, 32], strides = [1, 1]} : vector<2x96xf32> to vector<2x32xf32>
    %240 = vector.extract_strided_slice %230 {offsets = [0, 96], sizes = [2, 32], strides = [1, 1]} : vector<2x128xf32> to vector<2x32xf32>
    %241 = math.tanh %240 : vector<2x32xf32>
    %242 = arith.mulf %238, %226 : vector<2x32xf32>
    %243 = arith.mulf %237, %241 : vector<2x32xf32>
    %244 = arith.addf %242, %243 : vector<2x32xf32>
    %245 = math.tanh %244 : vector<2x32xf32>
    %246 = arith.mulf %239, %245 : vector<2x32xf32>
    %cst_70 = arith.constant dense<0.000000e+00> : vector<2x128xf32>
    %247 = tpu.matmul %246, %69, %cst_70 {dimension_numbers = #tpu.dot_dimension_numbers<[1], [0], [0], [1], [0, 0, 1, 1], [], []>} : vector<2x32xf32>, vector<32x128xf32>, vector<2x128xf32> -> vector<2x128xf32>
    %248 = arith.addf %102, %247 : vector<2x128xf32>
    %249 = vector.extract_strided_slice %248 {offsets = [0, 0], sizes = [2, 96], strides = [1, 1]} : vector<2x128xf32> to vector<2x96xf32>
    %250 = arith.negf %249 : vector<2x96xf32>
    %251 = math.exp %250 : vector<2x96xf32>
    %cst_71 = arith.constant 1.000000e+00 : f32
    %252 = vector.broadcast %cst_71 : f32 to vector<2x96xf32>
    %253 = arith.addf %252, %251 : vector<2x96xf32>
    %254 = arith.divf %252, %253 : vector<2x96xf32>
    %255 = vector.extract_strided_slice %254 {offsets = [0, 0], sizes = [2, 32], strides = [1, 1]} : vector<2x96xf32> to vector<2x32xf32>
    %256 = vector.extract_strided_slice %254 {offsets = [0, 32], sizes = [2, 32], strides = [1, 1]} : vector<2x96xf32> to vector<2x32xf32>
    %257 = vector.extract_strided_slice %254 {offsets = [0, 64], sizes = [2, 32], strides = [1, 1]} : vector<2x96xf32> to vector<2x32xf32>
    %258 = vector.extract_strided_slice %248 {offsets = [0, 96], sizes = [2, 32], strides = [1, 1]} : vector<2x128xf32> to vector<2x32xf32>
    %259 = math.tanh %258 : vector<2x32xf32>
    %260 = arith.mulf %256, %244 : vector<2x32xf32>
    %261 = arith.mulf %255, %259 : vector<2x32xf32>
    %262 = arith.addf %260, %261 : vector<2x32xf32>
    %263 = math.tanh %262 : vector<2x32xf32>
    %264 = arith.mulf %257, %263 : vector<2x32xf32>
    %cst_72 = arith.constant dense<0.000000e+00> : vector<2x128xf32>
    %265 = tpu.matmul %264, %69, %cst_72 {dimension_numbers = #tpu.dot_dimension_numbers<[1], [0], [0], [1], [0, 0, 1, 1], [], []>} : vector<2x32xf32>, vector<32x128xf32>, vector<2x128xf32> -> vector<2x128xf32>
    %266 = arith.addf %106, %265 : vector<2x128xf32>
    %267 = vector.extract_strided_slice %266 {offsets = [0, 0], sizes = [2, 96], strides = [1, 1]} : vector<2x128xf32> to vector<2x96xf32>
    %268 = arith.negf %267 : vector<2x96xf32>
    %269 = math.exp %268 : vector<2x96xf32>
    %cst_73 = arith.constant 1.000000e+00 : f32
    %270 = vector.broadcast %cst_73 : f32 to vector<2x96xf32>
    %271 = arith.addf %270, %269 : vector<2x96xf32>
    %272 = arith.divf %270, %271 : vector<2x96xf32>
    %273 = vector.extract_strided_slice %272 {offsets = [0, 0], sizes = [2, 32], strides = [1, 1]} : vector<2x96xf32> to vector<2x32xf32>
    %274 = vector.extract_strided_slice %272 {offsets = [0, 32], sizes = [2, 32], strides = [1, 1]} : vector<2x96xf32> to vector<2x32xf32>
    %275 = vector.extract_strided_slice %272 {offsets = [0, 64], sizes = [2, 32], strides = [1, 1]} : vector<2x96xf32> to vector<2x32xf32>
    %276 = vector.extract_strided_slice %266 {offsets = [0, 96], sizes = [2, 32], strides = [1, 1]} : vector<2x128xf32> to vector<2x32xf32>
    %277 = math.tanh %276 : vector<2x32xf32>
    %278 = arith.mulf %274, %262 : vector<2x32xf32>
    %279 = arith.mulf %273, %277 : vector<2x32xf32>
    %280 = arith.addf %278, %279 : vector<2x32xf32>
    %281 = math.tanh %280 : vector<2x32xf32>
    %282 = arith.mulf %275, %281 : vector<2x32xf32>
    %cst_74 = arith.constant dense<0.000000e+00> : vector<2x128xf32>
    %283 = tpu.matmul %282, %69, %cst_74 {dimension_numbers = #tpu.dot_dimension_numbers<[1], [0], [0], [1], [0, 0, 1, 1], [], []>} : vector<2x32xf32>, vector<32x128xf32>, vector<2x128xf32> -> vector<2x128xf32>
    %284 = arith.addf %110, %283 : vector<2x128xf32>
    %285 = vector.extract_strided_slice %284 {offsets = [0, 0], sizes = [2, 96], strides = [1, 1]} : vector<2x128xf32> to vector<2x96xf32>
    %286 = arith.negf %285 : vector<2x96xf32>
    %287 = math.exp %286 : vector<2x96xf32>
    %cst_75 = arith.constant 1.000000e+00 : f32
    %288 = vector.broadcast %cst_75 : f32 to vector<2x96xf32>
    %289 = arith.addf %288, %287 : vector<2x96xf32>
    %290 = arith.divf %288, %289 : vector<2x96xf32>
    %291 = vector.extract_strided_slice %290 {offsets = [0, 0], sizes = [2, 32], strides = [1, 1]} : vector<2x96xf32> to vector<2x32xf32>
    %292 = vector.extract_strided_slice %290 {offsets = [0, 32], sizes = [2, 32], strides = [1, 1]} : vector<2x96xf32> to vector<2x32xf32>
    %293 = vector.extract_strided_slice %290 {offsets = [0, 64], sizes = [2, 32], strides = [1, 1]} : vector<2x96xf32> to vector<2x32xf32>
    %294 = vector.extract_strided_slice %284 {offsets = [0, 96], sizes = [2, 32], strides = [1, 1]} : vector<2x128xf32> to vector<2x32xf32>
    %295 = math.tanh %294 : vector<2x32xf32>
    %296 = arith.mulf %292, %280 : vector<2x32xf32>
    %297 = arith.mulf %291, %295 : vector<2x32xf32>
    %298 = arith.addf %296, %297 : vector<2x32xf32>
    %299 = math.tanh %298 : vector<2x32xf32>
    %300 = arith.mulf %293, %299 : vector<2x32xf32>
    %cst_76 = arith.constant dense<0.000000e+00> : vector<2x128xf32>
    %301 = tpu.matmul %300, %69, %cst_76 {dimension_numbers = #tpu.dot_dimension_numbers<[1], [0], [0], [1], [0, 0, 1, 1], [], []>} : vector<2x32xf32>, vector<32x128xf32>, vector<2x128xf32> -> vector<2x128xf32>
    %302 = arith.addf %114, %301 : vector<2x128xf32>
    %303 = vector.extract_strided_slice %302 {offsets = [0, 0], sizes = [2, 96], strides = [1, 1]} : vector<2x128xf32> to vector<2x96xf32>
    %304 = arith.negf %303 : vector<2x96xf32>
    %305 = math.exp %304 : vector<2x96xf32>
    %cst_77 = arith.constant 1.000000e+00 : f32
    %306 = vector.broadcast %cst_77 : f32 to vector<2x96xf32>
    %307 = arith.addf %306, %305 : vector<2x96xf32>
    %308 = arith.divf %306, %307 : vector<2x96xf32>
    %309 = vector.extract_strided_slice %308 {offsets = [0, 0], sizes = [2, 32], strides = [1, 1]} : vector<2x96xf32> to vector<2x32xf32>
    %310 = vector.extract_strided_slice %308 {offsets = [0, 32], sizes = [2, 32], strides = [1, 1]} : vector<2x96xf32> to vector<2x32xf32>
    %311 = vector.extract_strided_slice %308 {offsets = [0, 64], sizes = [2, 32], strides = [1, 1]} : vector<2x96xf32> to vector<2x32xf32>
    %312 = vector.extract_strided_slice %302 {offsets = [0, 96], sizes = [2, 32], strides = [1, 1]} : vector<2x128xf32> to vector<2x32xf32>
    %313 = math.tanh %312 : vector<2x32xf32>
    %314 = arith.mulf %310, %298 : vector<2x32xf32>
    %315 = arith.mulf %309, %313 : vector<2x32xf32>
    %316 = arith.addf %314, %315 : vector<2x32xf32>
    %317 = math.tanh %316 : vector<2x32xf32>
    %318 = arith.mulf %311, %317 : vector<2x32xf32>
    %cst_78 = arith.constant dense<0.000000e+00> : vector<2x128xf32>
    %319 = tpu.matmul %318, %69, %cst_78 {dimension_numbers = #tpu.dot_dimension_numbers<[1], [0], [0], [1], [0, 0, 1, 1], [], []>} : vector<2x32xf32>, vector<32x128xf32>, vector<2x128xf32> -> vector<2x128xf32>
    %320 = arith.addf %118, %319 : vector<2x128xf32>
    %321 = vector.extract_strided_slice %320 {offsets = [0, 0], sizes = [2, 96], strides = [1, 1]} : vector<2x128xf32> to vector<2x96xf32>
    %322 = arith.negf %321 : vector<2x96xf32>
    %323 = math.exp %322 : vector<2x96xf32>
    %cst_79 = arith.constant 1.000000e+00 : f32
    %324 = vector.broadcast %cst_79 : f32 to vector<2x96xf32>
    %325 = arith.addf %324, %323 : vector<2x96xf32>
    %326 = arith.divf %324, %325 : vector<2x96xf32>
    %327 = vector.extract_strided_slice %326 {offsets = [0, 0], sizes = [2, 32], strides = [1, 1]} : vector<2x96xf32> to vector<2x32xf32>
    %328 = vector.extract_strided_slice %326 {offsets = [0, 32], sizes = [2, 32], strides = [1, 1]} : vector<2x96xf32> to vector<2x32xf32>
    %329 = vector.extract_strided_slice %326 {offsets = [0, 64], sizes = [2, 32], strides = [1, 1]} : vector<2x96xf32> to vector<2x32xf32>
    %330 = vector.extract_strided_slice %320 {offsets = [0, 96], sizes = [2, 32], strides = [1, 1]} : vector<2x128xf32> to vector<2x32xf32>
    %331 = math.tanh %330 : vector<2x32xf32>
    %332 = arith.mulf %328, %316 : vector<2x32xf32>
    %333 = arith.mulf %327, %331 : vector<2x32xf32>
    %334 = arith.addf %332, %333 : vector<2x32xf32>
    %335 = math.tanh %334 : vector<2x32xf32>
    %336 = arith.mulf %329, %335 : vector<2x32xf32>
    %c0_80 = arith.constant 0 : index
    %c0_81 = arith.constant 0 : index
    %337 = vector.load %arg16[%c0_80, %c0_81] : memref<32x5xf32, #tpu.memory_space<vmem>>, vector<32x5xf32>
    %cst_82 = arith.constant dense<0.000000e+00> : vector<2x5xf32>
    %338 = tpu.matmul %336, %337, %cst_82 {dimension_numbers = #tpu.dot_dimension_numbers<[1], [0], [0], [1], [0, 0, 1, 1], [], []>} : vector<2x32xf32>, vector<32x5xf32>, vector<2x5xf32> -> vector<2x5xf32>
    %c0_83 = arith.constant 0 : index
    %c0_84 = arith.constant 0 : index
    %339 = vector.load %arg17[%c0_83, %c0_84] : memref<1x5xf32, #tpu.memory_space<vmem>>, vector<1x5xf32>
    %340 = vector.broadcast %339 : vector<1x5xf32> to vector<2x5xf32>
    %341 = arith.addf %338, %340 : vector<2x5xf32>
    %c0_85 = arith.constant 0 : index
    %c0_86 = arith.constant 0 : index
    %342 = vector.load %arg18[%c0_85, %c0_86] : memref<2x5xf32, #tpu.memory_space<vmem>>, vector<2x5xf32>
    tpu.vector_store %arg18[%c0_85, %c0_86], %341 {strides = array<i32>} : memref<2x5xf32, #tpu.memory_space<vmem>>, vector<2x5xf32>,
    return
  }
  func.func @transform_0(%arg0: i32) -> (i32, i32, i32) {
    %c0_i32 = arith.constant 0 : i32
    %c0_i32_0 = arith.constant 0 : i32
    %c0_i32_1 = arith.constant 0 : i32
    %c0_i32_2 = arith.constant 0 : i32
    return %c0_i32, %c0_i32_0, %c0_i32_1 : i32, i32, i32
  }
  func.func @transform_1(%arg0: i32) -> (i32, i32) {
    %c0_i32 = arith.constant 0 : i32
    %c0_i32_0 = arith.constant 0 : i32
    %c0_i32_1 = arith.constant 0 : i32
    return %c0_i32, %c0_i32_0 : i32, i32
  }
  func.func @transform_2(%arg0: i32) -> (i32, i32) {
    %c0_i32 = arith.constant 0 : i32
    %c0_i32_0 = arith.constant 0 : i32
    %c0_i32_1 = arith.constant 0 : i32
    return %c0_i32, %c0_i32_0 : i32, i32
  }
  func.func @transform_3(%arg0: i32) -> (i32, i32) {
    %c0_i32 = arith.constant 0 : i32
    %c0_i32_0 = arith.constant 0 : i32
    %c0_i32_1 = arith.constant 0 : i32
    return %c0_i32, %c0_i32_0 : i32, i32
  }
  func.func @transform_4(%arg0: i32) -> (i32, i32) {
    %c0_i32 = arith.constant 0 : i32
    %c0_i32_0 = arith.constant 0 : i32
    %c0_i32_1 = arith.constant 0 : i32
    return %c0_i32, %c0_i32_0 : i32, i32
  }
  func.func @transform_5(%arg0: i32) -> (i32, i32) {
    %c0_i32 = arith.constant 0 : i32
    %c0_i32_0 = arith.constant 0 : i32
    %c0_i32_1 = arith.constant 0 : i32
    return %c0_i32, %c0_i32_0 : i32, i32
  }
  func.func @transform_6(%arg0: i32) -> (i32, i32) {
    %c0_i32 = arith.constant 0 : i32
    %c0_i32_0 = arith.constant 0 : i32
    %c0_i32_1 = arith.constant 0 : i32
    return %c0_i32, %c0_i32_0 : i32, i32
  }
  func.func @transform_7(%arg0: i32) -> (i32, i32) {
    %c0_i32 = arith.constant 0 : i32
    %c0_i32_0 = arith.constant 0 : i32
    %c0_i32_1 = arith.constant 0 : i32
    return %c0_i32, %c0_i32_0 : i32, i32
  }
  func.func @transform_8(%arg0: i32) -> (i32, i32) {
    %c0_i32 = arith.constant 0 : i32
    %c0_i32_0 = arith.constant 0 : i32
    %c0_i32_1 = arith.constant 0 : i32
    return %c0_i32, %c0_i32_0 : i32, i32
  }
  func.func @transform_9(%arg0: i32) -> (i32, i32) {
    %c0_i32 = arith.constant 0 : i32
    %c0_i32_0 = arith.constant 0 : i32
    %c0_i32_1 = arith.constant 0 : i32
    return %c0_i32, %c0_i32_0 : i32, i32
  }
  func.func @transform_10(%arg0: i32) -> (i32, i32) {
    %c0_i32 = arith.constant 0 : i32
    %c0_i32_0 = arith.constant 0 : i32
    %c0_i32_1 = arith.constant 0 : i32
    return %c0_i32, %c0_i32_0 : i32, i32
  }
  func.func @transform_11(%arg0: i32) -> (i32, i32) {
    %c0_i32 = arith.constant 0 : i32
    %c0_i32_0 = arith.constant 0 : i32
    %c0_i32_1 = arith.constant 0 : i32
    return %c0_i32, %c0_i32_0 : i32, i32
  }
  func.func @transform_12(%arg0: i32) -> (i32, i32) {
    %c0_i32 = arith.constant 0 : i32
    %c0_i32_0 = arith.constant 0 : i32
    %c0_i32_1 = arith.constant 0 : i32
    return %c0_i32, %c0_i32_0 : i32, i32
  }
  func.func @transform_13(%arg0: i32) -> (i32, i32) {
    %c0_i32 = arith.constant 0 : i32
    %c0_i32_0 = arith.constant 0 : i32
    %c0_i32_1 = arith.constant 0 : i32
    return %c0_i32, %c0_i32_0 : i32, i32
  }
  func.func @transform_14(%arg0: i32) -> (i32, i32) {
    %c0_i32 = arith.constant 0 : i32
    %c0_i32_0 = arith.constant 0 : i32
    %c0_i32_1 = arith.constant 0 : i32
    return %c0_i32, %c0_i32_0 : i32, i32
  }
  func.func @transform_15(%arg0: i32) -> (i32, i32) {
    %c0_i32 = arith.constant 0 : i32
    %c0_i32_0 = arith.constant 0 : i32
    %c0_i32_1 = arith.constant 0 : i32
    return %c0_i32, %c0_i32_0 : i32, i32
  }
  func.func @transform_16(%arg0: i32) -> (i32, i32) {
    %c0_i32 = arith.constant 0 : i32
    %c0_i32_0 = arith.constant 0 : i32
    %c0_i32_1 = arith.constant 0 : i32
    return %c0_i32, %c0_i32_0 : i32, i32
  }
  func.func @transform_17(%arg0: i32) -> (i32, i32) {
    %c0_i32 = arith.constant 0 : i32
    %c0_i32_0 = arith.constant 0 : i32
    %c0_i32_1 = arith.constant 0 : i32
    return %c0_i32, %c0_i32_0 : i32, i32
  }
}

</mosaic_0001>

<bundles_post_ra>
// kernel: cnn1d_lstm_forward.1
= control target key start
LH: loop header
LB: loop body
LE: loop exit
PB: predicated region body
PF: predicated region fallthrough
CT: control target
= control target key end

     0   :  { %s5258_s0 = inlined_call_operand.vmem [shape: f32[2,4,128], index: 0, kind: input, shape index: {}]   ;;  %s5259_s1 = inlined_call_operand.vmem [shape: f32[8,20], index: 1, kind: input, shape index: {}]   ;;  %s5260_s2 = inlined_call_operand.vmem [shape: f32[8,1], index: 2, kind: input, shape index: {}]   ;;  %s5261_s3 = inlined_call_operand.vmem [shape: f32[252,248], index: 3, kind: input, shape index: {}]   ;;  %s5262_s4 = inlined_call_operand.vmem [shape: f32[16,40], index: 4, kind: input, shape index: {}]   ;;  %s5263_s5 = inlined_call_operand.vmem [shape: f32[16,1], index: 5, kind: input, shape index: {}]   ;;  %s5264_s6 = inlined_call_operand.vmem [shape: f32[120,116], index: 6, kind: input, shape index: {}]   ;;  %s5265_s7 = inlined_call_operand.vmem [shape: f32[32,80], index: 7, kind: input, shape index: {}]   ;;  %s5266_s8 = inlined_call_operand.vmem [shape: f32[32,1], index: 8, kind: input, shape index: {}]   ;;  %s5267_s9 = inlined_call_operand.vmem [shape: f32[54,48], index: 9, kind: input, shape index: {}]   ;;  %s5268_s10 = inlined_call_operand.vmem [shape: f32[24,768], index: 10, kind: input, shape index: {}]   ;;  %s5269_s11 = inlined_call_operand.vmem [shape: f32[32,768], index: 11, kind: input, shape index: {}]   ;;  %s5270_s12 = inlined_call_operand.vmem [shape: f32[32,128], index: 12, kind: input, shape index: {}]   ;;  %s5271_s13 = inlined_call_operand.vmem [shape: f32[32,128], index: 13, kind: input, shape index: {}]   ;;  %s5272_s14 = inlined_call_operand.vmem [shape: f32[1,128], index: 14, kind: input, shape index: {}]   ;;  %s5273_s15 = inlined_call_operand.vmem [shape: f32[32,5], index: 15, kind: input, shape index: {}]   ;;  %s5274_s16 = inlined_call_operand.vmem [shape: f32[1,5], index: 16, kind: input, shape index: {}]   ;;  %s5275_s17 = inlined_call_operand.hbm [shape: f32[2,5], index: 17, kind: output, shape index: {}]  }
   0x1   :  { %5277 = sst [smem:[#allocation5_spill]] %s5258_s0 }
   0x2   :  { %5278 = sst [smem:[#allocation6_spill]] %s5259_s1 }
   0x3   :  { %s5279_s26 = sld [smem:[#allocation5_spill]]  ;;  %s4194_s27 = smov 126   ;;  %v4196_v2 = vmov 0.0   ;;  %v218_v3 = vld [vmem:[%s5261_s3 + $0xf8] sm:$0xff]  ;;  %v217_v4 = vld [vmem:[%s5261_s3 + $0xf0] sm:$0xff]  ;;  %v4197_v5 = vmov 0  }
   0x4   :  { %s4195_s28 = smov 124   ;;  %178 = vmatprep.mubr.f32.mxu0 %v4196_v2  ;;  %4074 = vset.pattern.permute.xlu0 %v4197_v5  ;;  %v216_v6 = vld [vmem:[%s5261_s3 + $0xe8] sm:$0xff]  ;;  %v215_v9 = vld [vmem:[%s5261_s3 + $0xe0] sm:$0xff]  ;;  %v214_v10 = vld [vmem:[%s5261_s3 + $0xd8] sm:$0xff]  ;;  %s4198_s0 = smov 125  }
   0x5   :  { %260 = vmatprep.subr.mxu1 %v218_v3  ;;  %4075 = vset.pattern.permute.xlu1 %v4197_v5  ;;  %v213_v11 = vld [vmem:[%s5261_s3 + $0xd0] sm:$0xff]  ;;  %v212_v12 = vld [vmem:[%s5261_s3 + $0xc8] sm:$0xff]  ;;  %v211_v13 = vld [vmem:[%s5261_s3 + $0xc0] sm:$0xff]  ;;  %s4199_s22 = smov 127  }
   0x6   :  { %261 = vmatpush1.msra.mxu1 %v217_v4  ;;  %v210_v14 = vld [vmem:[%s5261_s3 + $0xb8] sm:$0xff]  ;;  %v209_v15 = vld [vmem:[%s5261_s3 + $0xb0] sm:$0xff]  ;;  %v100_v16 = vld [vmem:[%s5260_s2] sm:$0xff] }
   0x7   :  { %262 = vmatprep.subr.mxu1 %v216_v6  ;;  %v208_v17 = vld [vmem:[%s5261_s3 + $0xa8] sm:$0xff]  ;;  %v207_v18 = vld [vmem:[%s5261_s3 + $0xa0] sm:$0xff]  ;;  %v206_v19 = vld [vmem:[%s5261_s3 + $0x98] sm:$0xff] }
   0x8   :  { %263 = vmatpush1.msra.mxu1 %v215_v9  ;;  %v205_v20 = vld [vmem:[%s5261_s3 + $0x90] sm:$0xff]  ;;  %v204_v21 = vld [vmem:[%s5261_s3 + $0x88] sm:$0xff]  ;;  %v203_v22 = vld [vmem:[%s5261_s3 + $0x80] sm:$0xff] }
   0x9   :  { %v4301_v0 = vld [vmem:[%s5279_s26] sm:$0xf]  ;;  %v4310_v1 = vld [vmem:[%s5279_s26 + $0x4] sm:$0xf]  ;;  %264 = vmatprep.subr.mxu1 %v214_v10  ;;  %v202_v23 = vld [vmem:[%s5261_s3 + $0x78] sm:$0xff] }
   0xa   :  { %73 = vrot.lane.b32.xlu1 %v4301_v0, %s4194_s27  ;;  %89 = vrot.lane.b32.xlu0 %v4301_v0, %s4195_s28  ;;  %v64_v7 = vrot.slane %v4310_v1, 4  ;;  %v63_v8 = vrot.slane %v4301_v0, 4  ;;  %v201_v24 = vld [vmem:[%s5261_s3 + $0x70] sm:$0xff]  ;;  %v200_v25 = vld [vmem:[%s5261_s3 + $0x68] sm:$0xff] }
   0xb   :  { %265 = vmatpush1.msra.mxu1 %v213_v11  ;;  %v199_v26 = vld [vmem:[%s5261_s3 + $0x60] sm:$0xff] }
   0xc   :  { %266 = vmatprep.subr.mxu1 %v212_v12 }
   0xd   :  { %267 = vmatpush1.msra.mxu1 %v211_v13 }
   0xe   :  { %75 = vrot.lane.b32.xlu1 %v4310_v1, %s4194_s27  ;;  %91 = vrot.lane.b32.xlu0 %v4310_v1, %s4195_s28 }
   0xf   :  { %268 = vmatprep.subr.mxu1 %v210_v14 }
  0x10   :  { %269 = vmatpush1.msra.mxu1 %v209_v15 }
  0x11   :  { %270 = vmatprep.subr.mxu1 %v208_v17 }
  0x12   :  { %83 = vrot.lane.b32.xlu1 %v64_v7, %s4198_s0  ;;  %81 = vrot.lane.b32.xlu0 %v63_v8, %s4198_s0 }
  0x13   :  { %271 = vmatpush1.msra.mxu1 %v207_v18 }
  0x14   :  { %272 = vmatprep.subr.mxu1 %v206_v19 }
  0x15   :  { %273 = vmatpush1.msra.mxu1 %v205_v20 }
  0x16   :  { %67 = vrot.lane.b32.xlu1 %v64_v7, %s4199_s22  ;;  %65 = vrot.lane.b32.xlu0 %v63_v8, %s4199_s22 }
  0x17   :  { %274 = vmatprep.subr.mxu1 %v204_v21 }
  0x18   :  { %275 = vmatpush1.msra.mxu1 %v203_v22 }
  0x19   :  { %276 = vmatprep.subr.mxu1 %v202_v23 }
  0x1a   :  { %103 = vperm.xlu0 %4074, %v100_v16  }
  0x1b   :  { %22 = vsyncpa [#allocation3], 0  ;;  %277 = vmatpush1.msra.mxu1 %v201_v24  ;;  %v198_v27 = vld [vmem:[%s5261_s3 + $0x58] sm:$0xff]  ;;  %v197_v28 = vld [vmem:[%s5261_s3 + $0x50] sm:$0xff]  ;;  %vm95_vm0 = vcmask 1043456   ;;  %vm93_vm1 = vcmask 1014784  }
  0x1c   :  { %278 = vmatprep.subr.mxu1 %v200_v25  ;;  %v196_v29 = vld [vmem:[%s5261_s3 + $0x48] sm:$0xff]  ;;  %v195_v30 = vld [vmem:[%s5261_s3 + $0x40] sm:$0xff]  ;;  %v194_v31 = vld [vmem:[%s5261_s3 + $0x38] sm:$0xff]  ;;  %vm77_vm2 = vcmask 1031168   ;;  %vm85_vm3 = vcmask 1022976   ;;  %vm69_vm4 = vcmask 1039360  }
  0x1d   :  { %279 = vmatpush1.msra.mxu1 %v199_v26  ;;  %v193_v32 = vld [vmem:[%s5261_s3 + $0x30] sm:$0xff]  ;;  %v192_v33 = vld [vmem:[%s5261_s3 + $0x28] sm:$0xff]  ;;  %v191_v34 = vld [vmem:[%s5261_s3 + $0x20] sm:$0xff]  ;;  %s5280_s25 = sld [smem:[#allocation6_spill]]  ;;  %vm106_vm5 = vcmask 162816   ;;  %s4200_s19 = smov 4  }
  0x1e   :  { %280 = vmatprep.subr.mxu1 %v198_v27  ;;  %v190_v35 = vld [vmem:[%s5261_s3 + $0x18] sm:$0xff]  ;;  %v189_v36 = vld [vmem:[%s5261_s3 + $0x10] sm:$0xff]  ;;  %v188_v37 = vld [vmem:[%s5261_s3 + $0x8] sm:$0xff]  ;;  %vm337_vm6 = vcmask 31744   ;;  %vm368_vm7 = vcmask 326656   ;;  %vm467_vm8 = vcmask 982016  }
  0x1f   :  { %281 = vmatpush1.msra.mxu1 %v197_v28  ;;  %v187_v38 = vld [vmem:[%s5261_s3] sm:$0xff]  ;;  %v250_v39 = vld [vmem:[%s5261_s3 + $0x1f8] sm:$0xf]  ;;  %v249_v40 = vld [vmem:[%s5261_s3 + $0x1f0] sm:$0xf]  ;;  %s4201_s26 = smov 70  }
  0x20   :  { %282 = vmatprep.subr.mxu1 %v196_v29  ;;  %v248_v41 = vld [vmem:[%s5261_s3 + $0x1e8] sm:$0xff]  ;;  %v247_v42 = vld [vmem:[%s5261_s3 + $0x1e0] sm:$0xff]  ;;  %v246_v43 = vld [vmem:[%s5261_s3 + $0x1d8] sm:$0xff]  ;;  %vm613_vm9 = vcmask 654336   ;;  %vm735_vm10 = vcmask 1045504   ;;  %vm722_vm11 = vcmask 441344  }
  0x21   :  { %283 = vmatpush1.msra.mxu1 %v195_v30  ;;  %v245_v44 = vld [vmem:[%s5261_s3 + $0x1d0] sm:$0xff]  ;;  %v244_v45 = vld [vmem:[%s5261_s3 + $0x1c8] sm:$0xff]  ;;  %v243_v46 = vld [vmem:[%s5261_s3 + $0x1c0] sm:$0xff]  ;;  %vm862_vm12 = vcmask 195584   ;;  %vm4203_vm13 = vmmov 0   ;;  %vm1244_vm14 = vcmask 1040384  }
  0x22   :  { %284 = vmatprep.subr.mxu1 %v194_v31  ;;  %v242_v47 = vld [vmem:[%s5261_s3 + $0x1b8] sm:$0xff]  ;;  %v241_v48 = vld [vmem:[%s5261_s3 + $0x1b0] sm:$0xff]  ;;  %v240_v49 = vld [vmem:[%s5261_s3 + $0x1a8] sm:$0xff]  ;;  %vm1263_vm15 = vcmask 261120   ;;  %s4204_s18 = smov 64   ;;  %s4205_s1 = smov 32  }
  0x23   :  { %285 = vmatpush1.msra.mxu1 %v193_v32  ;;  %v239_v50 = vld [vmem:[%s5261_s3 + $0x1a0] sm:$0xff]  ;;  %v238_v51 = vld [vmem:[%s5261_s3 + $0x198] sm:$0xff]  ;;  %v237_v52 = vld [vmem:[%s5261_s3 + $0x190] sm:$0xff] }
  0x24   :  { %286 = vmatprep.subr.mxu1 %v192_v33  ;;  %v236_v53 = vld [vmem:[%s5261_s3 + $0x188] sm:$0xff]  ;;  %v235_v54 = vld [vmem:[%s5261_s3 + $0x180] sm:$0xff]  ;;  %v234_v55 = vld [vmem:[%s5261_s3 + $0x178] sm:$0xff] }
  0x25   :  { %287 = vmatpush1.msra.mxu1 %v191_v34  ;;  %v233_v56 = vld [vmem:[%s5261_s3 + $0x170] sm:$0xff]  ;;  %v232_v57 = vld [vmem:[%s5261_s3 + $0x168] sm:$0xff]  ;;  %v231_v58 = vld [vmem:[%s5261_s3 + $0x160] sm:$0xff] }
  0x26   :  { %288 = vmatprep.subr.mxu1 %v190_v35  ;;  %v230_v59 = vld [vmem:[%s5261_s3 + $0x158] sm:$0xff]  ;;  %v229_v60 = vld [vmem:[%s5261_s3 + $0x150] sm:$0xff]  ;;  %v228_v61 = vld [vmem:[%s5261_s3 + $0x148] sm:$0xff] }
  0x27   :  { %289 = vmatpush1.msra.mxu1 %v189_v36  ;;  %v227_v62 = vld [vmem:[%s5261_s3 + $0x140] sm:$0xff]  ;;  %v226_v19 = vld [vmem:[%s5261_s3 + $0x138] sm:$0xff]  ;;  %v224_v20 = vld [vmem:[%s5261_s3 + $0x128] sm:$0xff] }
  0x28   :  { %290 = vmatprep.subr.mxu1 %v188_v37  ;;  %v60_v17 = vld [vmem:[%s5280_s25] sm:$0xff]  ;;  %v222_v21 = vld [vmem:[%s5261_s3 + $0x118] sm:$0xff]  ;;  %v221_v22 = vld [vmem:[%s5261_s3 + $0x110] sm:$0xff] }
  0x29   :  { %291 = vmatpush1.msra.mxu1 %v187_v38  ;;  %v220_v23 = vld [vmem:[%s5261_s3 + $0x108] sm:$0xff]  ;;  %v219_v24 = vld [vmem:[%s5261_s3 + $0x100] sm:$0xff] }
  0x2a   :  { %3453 = vmatprep.subr.msk.mxu1 %vm95_vm0, %v250_v39  ;;  %v341_v35 = vld [vmem:[%s5262_s4] sm:$0xff] }
  0x2b   :  { %3454 = vmatpush2.msk.msra.mxu1 %vm95_vm0, %v249_v40  ;;  %v356_v39 = vld [vmem:[%s5263_s5] sm:$0xff]  ;;  %v357_v40 = vld [vmem:[%s5263_s5 + $0x8] sm:$0xff] }
  0x2c   :  { %294 = vmatprep.subr.mxu1 %v248_v41 }
  0x2d   :  { %295 = vmatpush2.msra.mxu1 %v247_v42 }
  0x2e   :  { %296 = vmatprep.subr.mxu1 %v246_v43 }
  0x2f   :  { %297 = vmatpush2.msra.mxu1 %v245_v44 }
  0x30   :  { %298 = vmatprep.subr.mxu1 %v244_v45  ;;  %v342_v45 = vld [vmem:[%s5262_s4 + $0x8] sm:$0xff] }
  0x31   :  { %299 = vmatpush2.msra.mxu1 %v243_v46  ;;  %v466_v46 = vld [vmem:[%s5264_s6 + $0x70] sm:$0xff] }
  0x32   :  { %300 = vmatprep.subr.mxu1 %v242_v47  ;;  %v465_v47 = vld [vmem:[%s5264_s6 + $0x68] sm:$0xff] }
  0x33   :  { %301 = vmatpush2.msra.mxu1 %v241_v48  ;;  %v464_v48 = vld [vmem:[%s5264_s6 + $0x60] sm:$0xff] }
  0x34   :  { %302 = vmatprep.subr.mxu1 %v240_v49  ;;  %v463_v49 = vld [vmem:[%s5264_s6 + $0x58] sm:$0xff] }
  0x35   :  { %303 = vmatpush2.msra.mxu1 %v239_v50  ;;  %v462_v50 = vld [vmem:[%s5264_s6 + $0x50] sm:$0xff] }
  0x36   :  { %304 = vmatprep.subr.mxu1 %v238_v51  ;;  %v461_v51 = vld [vmem:[%s5264_s6 + $0x48] sm:$0xff] }
  0x37   :  { %305 = vmatpush2.msra.mxu1 %v237_v52  ;;  %v460_v52 = vld [vmem:[%s5264_s6 + $0x40] sm:$0xff] }
  0x38   :  { %306 = vmatprep.subr.mxu1 %v236_v53  ;;  %v459_v53 = vld [vmem:[%s5264_s6 + $0x38] sm:$0xff] }
  0x39   :  { %307 = vmatpush2.msra.mxu1 %v235_v54  ;;  %v458_v54 = vld [vmem:[%s5264_s6 + $0x30] sm:$0xff] }
  0x3a   :  { %308 = vmatprep.subr.mxu1 %v234_v55  ;;  %v457_v55 = vld [vmem:[%s5264_s6 + $0x28] sm:$0xff] }
  0x3b   :  { %309 = vmatpush2.msra.mxu1 %v233_v56  ;;  %v456_v56 = vld [vmem:[%s5264_s6 + $0x20] sm:$0xff] }
  0x3c   :  { %310 = vmatprep.subr.mxu1 %v232_v57  ;;  %v455_v57 = vld [vmem:[%s5264_s6 + $0x18] sm:$0xff] }
  0x3d   :  { %311 = vmatpush2.msra.mxu1 %v231_v58  ;;  %v454_v58 = vld [vmem:[%s5264_s6 + $0x10] sm:$0xff] }
  0x3e   :  { %312 = vmatprep.subr.mxu1 %v230_v59  ;;  %v453_v59 = vld [vmem:[%s5264_s6 + $0x8] sm:$0xff] }
  0x3f   :  { %313 = vmatpush2.msra.mxu1 %v229_v60  ;;  %v452_v60 = vld [vmem:[%s5264_s6] sm:$0xff]  ;;  %s4207_s6 = smov [#allocation2]  }
  0x40   :  { %314 = vmatprep.subr.mxu1 %v228_v61 }
  0x41   :  { %315 = vmatpush2.msra.mxu1 %v227_v62 }
  0x42   :  { %316 = vmatprep.subr.mxu1 %v226_v19  ;;  %v720_v19 = vld [vmem:[%s5267_s9 + $0x28] sm:$0xff] }
  0x7c   :  { %v74_v63 = vpop.permute.xlu1 %73  ;;  %v90_v3 = vpop.permute.xlu0 %89 }
  0x80   :  { %v76_v4 = vpop.permute.xlu1 %75  ;;  %v92_v5 = vpop.permute.xlu0 %91 }
  0x81   :  { %3450 = vmatprep.subr.msk.mxu0 %vm95_vm0, %v92_v5  ;;  %v94_v6 = vsel %vm93_vm1, %v90_v3, %v92_v5  ;;  %v78_v9 = vsel %vm77_vm2, %v74_v63, %v76_v4 }
  0x82   :  { %3451 = vmatpush1.msk.msra.mxu0 %vm95_vm0, %v94_v6 }
  0x84   :  { %v84_v7 = vpop.permute.xlu1 %83  ;;  %v82_v8 = vpop.permute.xlu0 %81 }
  0x85   :  { %v86_v10 = vsel %vm85_vm3, %v82_v8, %v84_v7  ;;  %v99_v11 = vsel %vm95_vm0, %v76_v4, %v84_v7 }
  0x86   :  { %142 = vmatprep.subr.mxu0 %v99_v11  ;;  %v98_v12 = vsel %vm95_vm0, %v78_v9, %v86_v10 }
  0x87   :  { %143 = vmatpush1.msra.mxu0 %v98_v12 }
  0x88   :  { %v68_v13 = vpop.permute.xlu1 %67  ;;  %v66_v14 = vpop.permute.xlu0 %65 }
  0x89   :  { %v70_v15 = vsel %vm69_vm4, %v66_v14, %v68_v13  ;;  %v97_v16 = vsel %vm95_vm0, %v4310_v1, %v68_v13  ;;  %v225_v1 = vld [vmem:[%s5261_s3 + $0x130] sm:$0xff]  ;;  %v559_v14 = vld [vmem:[%s5265_s7] sm:$0xff] }
  0x8a   :  { %144 = vmatprep.subr.mxu0 %v97_v16  ;;  %v96_v18 = vsel %vm95_vm0, %v4301_v0, %v70_v15  ;;  %317 = vmatpush2.msra.mxu1 %v225_v1  ;;  %v223_v0 = vld [vmem:[%s5261_s3 + $0x120] sm:$0xff]  ;;  %v590_v16 = vld [vmem:[%s5266_s8 + $0x8] sm:$0xff]  ;;  %v592_v1 = vld [vmem:[%s5266_s8 + $0x18] sm:$0xff]  ;;  %vm3433_vm0 = vcmask 33792  }
  0x8b   :  { %145 = vmatpush1.msra.mxu0 %v96_v18  ;;  %318 = vmatprep.subr.mxu1 %v224_v20  ;;  %v589_v15 = vld [vmem:[%s5266_s8] sm:$0xff]  ;;  %v721_v18 = vld [vmem:[%s5267_s9 + $0x30] sm:$0x3f] }
  0x8c   :  { %3452 = vmatmul.mubr.msk.f32.vlgmr.msra.gmra.mxu0 %vm106_vm5, %v60_v17  ;;  %319 = vmatpush2.msra.mxu1 %v223_v0  ;;  %v591_v17 = vld [vmem:[%s5266_s8 + $0x10] sm:$0xff]  ;;  %v719_v20 = vld [vmem:[%s5267_s9 + $0x20] sm:$0xff] }
  0x8d   :  { %320 = vmatprep.subr.mxu1 %v222_v21  ;;  %3703 = vmatprep.mubr.msk.f32.mxu0 %vm368_vm7, %v341_v35 }
  0x8e   :  { %321 = vmatpush2.msra.mxu1 %v221_v22 }
  0x8f   :  { %322 = vmatprep.subr.mxu1 %v220_v23 }
  0x90   :  { %323 = vmatpush2.msra.mxu1 %v219_v24 }
  0x91   :  { %3765 = vmatprep.subr.msk.mxu1 %vm735_vm10, %v721_v18 }
  0x95   :  { %v104_v25 = vpop.permute.xlu0 %103 }
 0x14c   :  { %v180_v26 = vpop.f32.mrf.mxu0 }
 0x14d   :  { %v181_v27 = vadd.f32 %v180_v26, %v104_v25 }
 0x14e   :  { %v182_v28 = vpop.f32.mrf.mxu0 }
 0x14f   :  { %v183_v29 = vadd.f32 %v182_v28, %v104_v25  ;;  %v185_v31 = vmax.f32 %v181_v27, 0.0  ;;  %v560_v28 = vld [vmem:[%s5265_s7 + $0x8] sm:$0xff] }
 0x151   :  { %v186_v30 = vmax.f32 %v183_v29, 0.0  ;;  %v561_v29 = vld [vmem:[%s5265_s7 + $0x10] sm:$0xff] }
 0x153   :  { %3455 = vmatprep.mubr.msk.f32.mxu1 %vm93_vm1, %v186_v30  ;;  %v562_v30 = vld [vmem:[%s5265_s7 + $0x18] sm:$0xff] }
 0x154   :  { %325 = vmatmul.mubr.f32.vlgmr.msra.gmra.mxu1 %v185_v31  ;;  %v718_v31 = vld [vmem:[%s5267_s9 + $0x18] sm:$0xff] }
 0x155   :  { %3766 = vmatpush3.msk.msra.mxu1 %vm735_vm10, %v721_v18 }
 0x156   :  { %3767 = vmatprep.subr.mxu1 %v720_v19 }
 0x157   :  { %3768 = vmatpush3.msra.mxu1 %v720_v19 }
 0x158   :  { %3769 = vmatprep.subr.mxu1 %v719_v20 }
 0x159   :  { %3770 = vmatpush3.msra.mxu1 %v719_v20  ;;  %v4744_v20 = vld [vmem:[%s5270_s12 + $0x10] sm:$0xff] }
 0x15a   :  { %3771 = vmatprep.subr.mxu1 %v718_v31 }
 0x15b   :  { %3772 = vmatpush3.msra.mxu1 %v718_v31 }
 0x214   :  { %v326_v32 = vpop.f32.mrf.mxu1 }
 0x215   :  { %333 = vrot.lane.b32.xlu1 %v326_v32, %s4200_s19 }
 0x216   :  { %v328_v33 = vpop.f32.mrf.mxu1 }
 0x219   :  { %335 = vrot.lane.b32.xlu1 %v328_v33, %s4200_s19  ;;  %v716_v33 = vld [vmem:[%s5267_s9 + $0x8] sm:$0xff] }
 0x287   :  { %v334_v34 = vpop.permute.xlu1 %333 }
 0x28b   :  { %v336_v36 = vpop.permute.xlu1 %335 }
 0x28c   :  { %v338_v37 = vsel %vm337_vm6, %v334_v34, %v336_v36  ;;  %v715_v34 = vld [vmem:[%s5267_s9] sm:$0xff] }
 0x28d   :  { %v340_v38 = vmax.f32 %v326_v32, %v338_v37  ;;  %v717_v32 = vld [vmem:[%s5267_s9 + $0x10] sm:$0xff] }
 0x28e   :  { %3773 = vmatprep.subr.mxu1 %v717_v32 }
 0x28f   :  { %350 = vrot.lane.b32.xlu1 %v340_v38, %s4198_s0  ;;  %353 = vrot.lane.b32.xlu0 %v340_v38, %s4195_s28 }
 0x290   :  { %3774 = vmatpush3.msra.mxu1 %v717_v32  ;;  %v1151_v32 = vld [vmem:[%s5269_s11 + $0x48] sm:$0xff] }
 0x291   :  { %3775 = vmatprep.subr.mxu1 %v716_v33 }
 0x292   :  { %3776 = vmatpush3.msra.mxu1 %v716_v33  ;;  %v1154_v33 = vld [vmem:[%s5269_s11 + $0x60] sm:$0xff] }
 0x293   :  { %344 = vrot.lane.b32.xlu1 %v340_v38, %s4199_s22  ;;  %347 = vrot.lane.b32.xlu0 %v340_v38, %s4194_s27 }
 0x294   :  { %3777 = vmatprep.subr.mxu1 %v715_v34 }
 0x295   :  { %3778 = vmatpush3.msra.mxu1 %v715_v34 }
 0x297   :  { %360 = vperm.xlu0 %4074, %v356_v39   ;;  %365 = vperm.xlu1 %4075, %v357_v40  }
 0x301   :  { %v351_v41 = vpop.permute.xlu1 %350  ;;  %v354_v42 = vpop.permute.xlu0 %353 }
 0x302   :  { %3693 = vmatprep.subr.mxu0 %v354_v42 }
 0x303   :  { %3694 = vmatpush3.msra.mxu0 %v354_v42 }
 0x304   :  { %3695 = vmatprep.subr.mxu0 %v351_v41 }
 0x305   :  { %3696 = vmatpush3.msra.mxu0 %v351_v41  ;;  %v348_v43 = vpop.permute.xlu0 %347  ;;  %v345_v44 = vpop.permute.xlu1 %344 }
 0x306   :  { %3697 = vmatprep.subr.mxu0 %v348_v43 }
 0x307   :  { %3698 = vmatpush3.msra.mxu0 %v348_v43 }
 0x308   :  { %3699 = vmatprep.subr.mxu0 %v345_v44 }
 0x309   :  { %3700 = vmatpush3.msra.mxu0 %v345_v44 }
 0x30a   :  { %3701 = vmatprep.subr.mxu0 %v340_v38 }
 0x30b   :  { %3702 = vmatpush3.msra.mxu0 %v340_v38 }
 0x30c   :  { %3704 = vmatmul.mubr.msk.f32.vlgmr.msra.gmra.mxu0 %vm368_vm7, %v342_v45  ;;  %3706 = vmatprep.subr.mxu0 %v466_v46 }
 0x30d   :  { %3707 = vmatpush3.msra.mxu0 %v466_v46 }
 0x30e   :  { %3708 = vmatprep.subr.mxu0 %v465_v47 }
 0x30f   :  { %3709 = vmatpush3.msra.mxu0 %v465_v47 }
 0x310   :  { %3710 = vmatprep.subr.mxu0 %v464_v48 }
 0x311   :  { %3711 = vmatpush3.msra.mxu0 %v464_v48 }
 0x312   :  { %3712 = vmatprep.subr.mxu0 %v463_v49  ;;  %v366_v61 = vpop.permute.xlu1 %365  ;;  %v361_v63 = vpop.permute.xlu0 %360 }
 0x313   :  { %3713 = vmatpush3.msra.mxu0 %v463_v49 }
 0x314   :  { %3714 = vmatprep.subr.mxu0 %v462_v50 }
 0x315   :  { %3715 = vmatpush3.msra.mxu0 %v462_v50 }
 0x316   :  { %3716 = vmatprep.subr.mxu0 %v461_v51 }
 0x317   :  { %3717 = vmatpush3.msra.mxu0 %v461_v51  ;;  %v859_v51 = vld [vmem:[%s5268_s10 + $0x78] sm:$0xff] }
 0x318   :  { %3718 = vmatprep.subr.mxu0 %v460_v52  ;;  %990 = vmatprep.subr.mxu1 %v859_v51 }
 0x319   :  { %3719 = vmatpush3.msra.mxu0 %v460_v52  ;;  %v858_v52 = vld [vmem:[%s5268_s10 + $0x70] sm:$0xff] }
 0x31a   :  { %3720 = vmatprep.subr.mxu0 %v459_v53 }
 0x31b   :  { %3721 = vmatpush3.msra.mxu0 %v459_v53  ;;  %v857_v53 = vld [vmem:[%s5268_s10 + $0x68] sm:$0xff] }
 0x31c   :  { %3722 = vmatprep.subr.mxu0 %v458_v54 }
 0x31d   :  { %3723 = vmatpush3.msra.mxu0 %v458_v54  ;;  %v856_v54 = vld [vmem:[%s5268_s10 + $0x60] sm:$0xff] }
 0x31e   :  { %3724 = vmatprep.subr.mxu0 %v457_v55 }
 0x31f   :  { %3725 = vmatpush3.msra.mxu0 %v457_v55  ;;  %v853_v55 = vld [vmem:[%s5268_s10 + $0x48] sm:$0xff] }
 0x320   :  { %3726 = vmatprep.subr.mxu0 %v456_v56 }
 0x321   :  { %3727 = vmatpush3.msra.mxu0 %v456_v56  ;;  %v852_v56 = vld [vmem:[%s5268_s10 + $0x40] sm:$0xff] }
 0x322   :  { %3728 = vmatprep.subr.mxu0 %v455_v57 }
 0x323   :  { %3729 = vmatpush3.msra.mxu0 %v455_v57  ;;  %v851_v57 = vld [vmem:[%s5268_s10 + $0x38] sm:$0xff] }
 0x324   :  { %3730 = vmatprep.subr.mxu0 %v454_v58 }
 0x325   :  { %3731 = vmatpush3.msra.mxu0 %v454_v58  ;;  %v850_v58 = vld [vmem:[%s5268_s10 + $0x30] sm:$0xff] }
 0x326   :  { %3732 = vmatprep.subr.mxu0 %v453_v59 }
 0x327   :  { %3733 = vmatpush3.msra.mxu0 %v453_v59  ;;  %v847_v59 = vld [vmem:[%s5268_s10 + $0x18] sm:$0xff] }
 0x328   :  { %3734 = vmatprep.subr.mxu0 %v452_v60 }
 0x329   :  { %3735 = vmatpush3.msra.mxu0 %v452_v60  ;;  %v845_v60 = vld [vmem:[%s5268_s10 + $0x8] sm:$0xff] }
 0x3cc   :  { %v3705_v62 = vpop.f32.mrf.mxu0 }
 0x3cd   :  { %v447_v3 = vadd.f32 %v3705_v62, %v366_v61  ;;  %v846_v61 = vld [vmem:[%s5268_s10 + $0x10] sm:$0xff]  ;;  %v844_v62 = vld [vmem:[%s5268_s10] sm:$0xff] }
 0x3ce   :  { %v441_v4 = vpop.f32.mrf.mxu0 }
 0x3cf   :  { %v442_v5 = vadd.f32 %v441_v4, %v361_v63  ;;  %v451_v7 = vmax.f32 %v447_v3, 0.0  ;;  %v861_v63 = vld [vmem:[%s5268_s10 + $0x88] sm:$0xff] }
 0x3d1   :  { %v450_v6 = vmax.f32 %v442_v5, 0.0 }
 0x3d3   :  { %3736 = vmatprep.mubr.msk.f32.mxu0 %vm467_vm8, %v450_v6 }
 0x3d4   :  { %3737 = vmatmul.mubr.msk.f32.vlgmr.msra.gmra.mxu0 %vm467_vm8, %v451_v7 }
 0x3d5   :  { %3759 = vmatprep.mubr.msk.f32.mxu0 %vm613_vm9, %v559_v14 }
 0x494   :  { %v3738_v8 = vpop.f32.mrf.mxu0 }
 0x495   :  { %553 = vrot.lane.b32.xlu0 %v3738_v8, %s4201_s26 }
 0x496   :  { %v540_v9 = vpop.f32.mrf.mxu0 }
 0x497   :  { %551 = vrot.lane.b32.xlu1 %v540_v9, %s4201_s26 }
 0x507   :  { %v554_v10 = vpop.permute.xlu0 %553 }
 0x508   :  { %v558_v11 = vmax.f32 %v3738_v8, %v554_v10 }
 0x509   :  { %v552_v12 = vpop.permute.xlu1 %551 }
 0x50a   :  { %v557_v13 = vmax.f32 %v540_v9, %v552_v12  ;;  %585 = vrot.lane.b32.xlu0 %v558_v11, %s4195_s28  ;;  %v860_v9 = vld [vmem:[%s5268_s10 + $0x80] sm:$0xff]  ;;  %v854_v12 = vld [vmem:[%s5268_s10 + $0x50] sm:$0xff] }
 0x50c   :  { %583 = vrot.lane.b32.xlu1 %v557_v13, %s4195_s28 }
 0x50e   :  { %579 = vrot.lane.b32.xlu0 %v558_v11, %s4198_s0 }
 0x510   :  { %577 = vrot.lane.b32.xlu1 %v557_v13, %s4198_s0 }
 0x512   :  { %573 = vrot.lane.b32.xlu0 %v558_v11, %s4194_s27 }
 0x514   :  { %571 = vrot.lane.b32.xlu1 %v557_v13, %s4194_s27  ;;  %s4202_s27 = smov 104  }
 0x516   :  { %567 = vrot.lane.b32.xlu0 %v558_v11, %s4199_s22 }
 0x518   :  { %565 = vrot.lane.b32.xlu1 %v557_v13, %s4199_s22 }
 0x51a   :  { %595 = vperm.xlu0 %4074, %v589_v15   ;;  %v849_v15 = vld [vmem:[%s5268_s10 + $0x28] sm:$0xff] }
 0x51c   :  { %600 = vperm.xlu1 %4075, %v590_v16   ;;  %v848_v16 = vld [vmem:[%s5268_s10 + $0x20] sm:$0xff] }
 0x51e   :  { %605 = vperm.xlu0 %4074, %v591_v17  }
 0x520   :  { %610 = vperm.xlu1 %4075, %v592_v1   ;;  %v4736_v1 = vld [vmem:[%s5270_s12 + $0x18] sm:$0xff] }
 0x57c   :  { %v586_v0 = vpop.permute.xlu0 %585 }
 0x57d   :  { %3739 = vmatprep.subr.mxu0 %v586_v0 }
 0x57e   :  { %3740 = vmatpush3.msra.mxu0 %v586_v0  ;;  %v584_v21 = vpop.permute.xlu1 %583  ;;  %v4753_v0 = vld [vmem:[%s5270_s12 + $0x8] sm:$0xff] }
 0x57f   :  { %3741 = vmatprep.subr.mxu0 %v584_v21 }
 0x580   :  { %v580_v22 = vpop.permute.xlu0 %579  ;;  %3742 = vmatpush3.msra.mxu0 %v584_v21  ;;  %v4762_v21 = vld [vmem:[%s5270_s12] sm:$0xff] }
 0x581   :  { %3743 = vmatprep.subr.mxu0 %v580_v22 }
 0x582   :  { %3744 = vmatpush3.msra.mxu0 %v580_v22  ;;  %v578_v23 = vpop.permute.xlu1 %577 }
 0x583   :  { %3745 = vmatprep.subr.mxu0 %v578_v23 }
 0x584   :  { %v574_v24 = vpop.permute.xlu0 %573  ;;  %3746 = vmatpush3.msra.mxu0 %v578_v23 }
 0x585   :  { %3747 = vmatprep.subr.mxu0 %v574_v24 }
 0x586   :  { %3748 = vmatpush3.msra.mxu0 %v574_v24  ;;  %v572_v25 = vpop.permute.xlu1 %571 }
 0x587   :  { %3749 = vmatprep.subr.mxu0 %v572_v25 }
 0x588   :  { %v568_v26 = vpop.permute.xlu0 %567  ;;  %3750 = vmatpush3.msra.mxu0 %v572_v25 }
 0x589   :  { %3751 = vmatprep.subr.mxu0 %v568_v26 }
 0x58a   :  { %3752 = vmatpush3.msra.mxu0 %v568_v26  ;;  %v566_v27 = vpop.permute.xlu1 %565 }
 0x58b   :  { %3753 = vmatprep.subr.mxu0 %v566_v27 }
 0x58c   :  { %3754 = vmatpush3.msra.mxu0 %v566_v27  ;;  %v1148_v27 = vld [vmem:[%s5269_s11 + $0x30] sm:$0xff] }
 0x58d   :  { %3755 = vmatprep.subr.mxu0 %v558_v11 }
 0x58e   :  { %3756 = vmatpush3.msra.mxu0 %v558_v11  ;;  %v855_v11 = vld [vmem:[%s5268_s10 + $0x58] sm:$0xff] }
 0x58f   :  { %3757 = vmatprep.subr.mxu0 %v557_v13 }
 0x590   :  { %3758 = vmatpush3.msra.mxu0 %v557_v13 }
 0x591   :  { %3760 = vmatmul.mubr.msk.f32.vlgmr.msra.gmra.mxu0 %vm613_vm9, %v560_v28  ;;  %901 = vmatprep.subr.mxu0 %v857_v53  ;;  %v1156_v53 = vld [vmem:[%s5269_s11 + $0x70] sm:$0xff] }
 0x592   :  { %3762 = vmatprep.mubr.msk.f32.mxu0 %vm613_vm9, %v561_v29  ;;  %902 = vmatpush1.msra.mxu0 %v856_v54  ;;  %v1142_v29 = vld [vmem:[%s5269_s11] sm:$0xff] }
 0x593   :  { %903 = vmatprep.subr.mxu0 %v851_v57 }
 0x594   :  { %904 = vmatpush1.msra.mxu0 %v850_v58 }
 0x595   :  { %3763 = vmatmul.mubr.msk.f32.gmra.mxu0 %vm613_vm9, %v562_v30  ;;  %v596_v36 = vpop.permute.xlu0 %595  ;;  %905 = vmatprep.subr.mxu0 %v845_v60  ;;  %v1161_v60 = vld [vmem:[%s5269_s11 + $0x98] sm:$0xff] }
 0x596   :  { %939 = vmatprep.mubr.f32.mxu0 %v4196_v2  ;;  %906 = vmatpush1.msra.mxu0 %v844_v62 }
 0x597   :  { %v601_v35 = vpop.permute.xlu1 %600  ;;  %1079 = vmatprep.subr.mxu0 %v861_v63 }
 0x599   :  { %v606_v44 = vpop.permute.xlu0 %605 }
 0x59b   :  { %v611_v42 = vpop.permute.xlu1 %610 }
 0x651   :  { %v3761_v37 = vpop.f32.mrf.mxu0 }
 0x652   :  { %v698_v38 = vadd.f32 %v3761_v37, %v601_v35  ;;  %v1149_v35 = vld [vmem:[%s5269_s11 + $0x38] sm:$0xff] }
 0x653   :  { %v692_v39 = vpop.f32.mrf.mxu0 }
 0x654   :  { %v693_v40 = vadd.f32 %v692_v39, %v596_v36  ;;  %v712_v45 = vmax.f32 %v698_v38, 0.0  ;;  %v1145_v36 = vld [vmem:[%s5269_s11 + $0x18] sm:$0xff] }
 0x655   :  { %v3764_v41 = vpop.f32.mrf.mxu0  ;;  %v1157_v39 = vld [vmem:[%s5269_s11 + $0x78] sm:$0xff] }
 0x656   :  { %v711_v43 = vmax.f32 %v693_v40, 0.0  ;;  %v708_v46 = vadd.f32 %v3764_v41, %v611_v42  ;;  %v1143_v41 = vld [vmem:[%s5269_s11 + $0x8] sm:$0xff]  ;;  %v1150_v42 = vld [vmem:[%s5269_s11 + $0x40] sm:$0xff] }
 0x657   :  { %v702_v47 = vpop.f32.mrf.mxu0 }
 0x658   :  { %v703_v48 = vadd.f32 %v702_v47, %v606_v44  ;;  %3779 = vmatprep.mubr.msk.f32.mxu1 %vm722_vm11, %v711_v43  ;;  %v714_v50 = vmax.f32 %v708_v46, 0.0 }
 0x659   :  { %3780 = vmatmul.mubr.msk.f32.vlgmr.msra.gmra.mxu1 %vm722_vm11, %v712_v45  ;;  %v1155_v45 = vld [vmem:[%s5269_s11 + $0x68] sm:$0xff] }
 0x65a   :  { %v713_v49 = vmax.f32 %v703_v48, 0.0  ;;  %991 = vmatpush1.msra.mxu1 %v858_v52 }
 0x65b   :  { %992 = vmatprep.subr.mxu1 %v853_v55 }
 0x65c   :  { %3782 = vmatprep.mubr.msk.f32.mxu1 %vm722_vm11, %v713_v49  ;;  %993 = vmatpush1.msra.mxu1 %v852_v56  ;;  %v1160_v49 = vld [vmem:[%s5269_s11 + $0x90] sm:$0xff] }
 0x65d   :  { %3783 = vmatmul.mubr.msk.f32.gmra.mxu1 %vm722_vm11, %v714_v50  ;;  %994 = vmatprep.subr.mxu1 %v847_v59  ;;  %v1144_v50 = vld [vmem:[%s5269_s11 + $0x10] sm:$0xff] }
 0x65e   :  { %1028 = vmatprep.mubr.f32.mxu1 %v4196_v2  ;;  %995 = vmatpush1.msra.mxu1 %v846_v61  ;;  %v1163_v61 = vld [vmem:[%s5269_s11 + $0xa8] sm:$0xff] }
 0x65f   :  { %3785 = vmatprep.subr.mxu1 %v4196_v2 }
 0x719   :  { %v3781_v3 = vpop.f32.mrf.mxu1 }
 0x71a   :  { %830 = vrot.lane.b32.xlu1 %v3781_v3, %s4202_s27 }
 0x71b   :  { %v805_v4 = vpop.f32.mrf.mxu1 }
 0x71c   :  { %828 = vrot.lane.b32.xlu0 %v805_v4, %s4202_s27 }
 0x71d   :  { %v3784_v5 = vpop.f32.mrf.mxu1 }
 0x71e   :  { %834 = vrot.lane.b32.xlu1 %v3784_v5, %s4202_s27 }
 0x71f   :  { %v815_v6 = vpop.f32.mrf.mxu1 }
 0x720   :  { %832 = vrot.lane.b32.xlu0 %v815_v6, %s4202_s27 }
 0x78c   :  { %v831_v10 = vpop.permute.xlu1 %830 }
 0x78d   :  { %v841_v13 = vmax.f32 %v3781_v3, %v831_v10 }
 0x78e   :  { %v829_v7 = vpop.permute.xlu0 %828 }
 0x78f   :  { %v840_v8 = vmax.f32 %v805_v4, %v829_v7  ;;  %v1162_v4 = vld [vmem:[%s5269_s11 + $0xa0] sm:$0xff] }
 0x790   :  { %v835_v18 = vpop.permute.xlu1 %834 }
 0x791   :  { %3469 = vmatmul.mubr.msk.f32.vlgmr.msra.gmra.mxu0 %vm862_vm12, %v840_v8  ;;  %3473 = vmatmul.mubr.msk.f32.vlgmr.msra.gmra.mxu1 %vm862_vm12, %v840_v8  ;;  %v843_v19 = vmax.f32 %v3784_v5, %v835_v18 }
 0x792   :  { %1080 = vmatpush1.msra.mxu0 %v860_v9  ;;  %945 = vmatprep.mubr.f32.mxu0 %v4196_v2  ;;  %v833_v14 = vpop.permute.xlu0 %832 }
 0x793   :  { %1034 = vmatprep.mubr.f32.mxu1 %v4196_v2  ;;  %1081 = vmatprep.subr.mxu0 %v855_v11  ;;  %v842_v17 = vmax.f32 %v815_v6, %v833_v14 }
 0x794   :  { %1082 = vmatpush1.msra.mxu0 %v854_v12  ;;  %3786 = vmatpush3.msra.mxu1 %v4736_v1 }
 0x795   :  { %3470 = vmatmul.mubr.msk.f32.gmra.mxu0 %vm862_vm12, %v841_v13  ;;  %3474 = vmatmul.mubr.msk.f32.gmra.mxu1 %vm862_vm12, %v841_v13 }
 0x796   :  { %951 = vmatprep.mubr.f32.mxu0 %v4196_v2  ;;  %1040 = vmatprep.mubr.f32.mxu1 %v4196_v2 }
 0x797   :  { %1083 = vmatprep.subr.mxu0 %v849_v15  ;;  %3787 = vmatprep.subr.mxu1 %v4196_v2 }
 0x798   :  { %1084 = vmatpush1.msra.mxu0 %v848_v16  ;;  %3788 = vmatpush3.msra.mxu1 %v4744_v20 }
 0x799   :  { %3471 = vmatmul.mubr.msk.f32.gmra.mxu0 %vm862_vm12, %v842_v17  ;;  %3475 = vmatmul.mubr.msk.f32.gmra.mxu1 %vm862_vm12, %v842_v17 }
 0x79a   :  { %957 = vmatprep.mubr.f32.mxu0 %v4196_v2  ;;  %1046 = vmatprep.mubr.f32.mxu1 %v4196_v2 }
 0x79b   :  { %3796 = vmatprep.subr.mxu0 %v4196_v2  ;;  %3789 = vmatprep.subr.mxu1 %v4196_v2 }
 0x79c   :  { %3790 = vmatpush3.msra.mxu1 %v4753_v0 }
 0x79d   :  { %3472 = vmatmul.mubr.msk.f32.gmra.mxu0 %vm862_vm12, %v843_v19  ;;  %3476 = vmatmul.mubr.msk.f32.gmra.mxu1 %vm862_vm12, %v843_v19 }
 0x79e   :  { %1117 = vmatprep.mubr.f32.mxu0 %v4196_v2  ;;  %3791 = vmatprep.subr.mxu1 %v4196_v2 }
 0x79f   :  { %3792 = vmatpush3.msra.mxu1 %v4762_v21  ;;  %3793 = vmatprep.mubr.msk.f32.mxu1 %vm4203_vm13, %v4196_v2 }
 0x7a0   :  { %3807 = vmatprep.subr.mxu1 %v4196_v2 }
 0x7a1   :  { %3477 = vmatmul.mubr.msk.f32.vlgmr.msra.gmra.mxu0 %vm862_vm12, %v840_v8 }
 0x7a2   :  { %1123 = vmatprep.mubr.f32.mxu0 %v4196_v2  ;;  %3797 = vmatpush3.msra.mxu0 %v4736_v1 }
 0x7a3   :  { %3798 = vmatprep.subr.mxu0 %v4196_v2 }
 0x7a4   :  { %3799 = vmatpush3.msra.mxu0 %v4744_v20 }
 0x7a5   :  { %3478 = vmatmul.mubr.msk.f32.gmra.mxu0 %vm862_vm12, %v841_v13  ;;  %3800 = vmatprep.subr.mxu0 %v4196_v2 }
 0x7a6   :  { %1129 = vmatprep.mubr.f32.mxu0 %v4196_v2  ;;  %3801 = vmatpush3.msra.mxu0 %v4753_v0 }
 0x7a7   :  { %3802 = vmatprep.subr.mxu0 %v4196_v2 }
 0x7a8   :  { %3803 = vmatpush3.msra.mxu0 %v4762_v21 }
 0x7a9   :  { %3479 = vmatmul.mubr.msk.f32.gmra.mxu0 %vm862_vm12, %v842_v17  ;;  %3818 = vmatprep.subr.mxu0 %v4196_v2 }
 0x7aa   :  { %1135 = vmatprep.mubr.f32.mxu0 %v4196_v2 }
 0x7ad   :  { %3480 = vmatmul.mubr.msk.f32.gmra.mxu0 %vm862_vm12, %v843_v19 }
 0x7ae   :  { %3804 = vmatprep.mubr.msk.f32.mxu0 %vm4203_vm13, %v4196_v2 }
 0x851   :  { %v941_v22 = vpop.f32.mrf.mxu0  ;;  %v1030_v23 = vpop.f32.mrf.mxu1 }
 0x852   :  { %v1166_v40 = vmul.f32 %v1142_v29, %v941_v22  ;;  %v1168_v5 = vmul.f32 %v1144_v50, %v1030_v23  ;;  %v1152_v29 = vld [vmem:[%s5269_s11 + $0x50] sm:$0xff] }
 0x853   :  { %v943_v24 = vpop.f32.mrf.mxu0  ;;  %v1032_v25 = vpop.f32.mrf.mxu1 }
 0x854   :  { %v1169_v51 = vmul.f32 %v1145_v36, %v1032_v25  ;;  %v1167_v55 = vmul.f32 %v1143_v41, %v943_v24 }
 0x855   :  { %v947_v26 = vpop.f32.mrf.mxu0  ;;  %v1036_v28 = vpop.f32.mrf.mxu1 }
 0x856   :  { %v1172_v34 = vmul.f32 %v1148_v27, %v947_v26  ;;  %v1174_v56 = vmul.f32 %v1150_v42, %v1036_v28 }
 0x857   :  { %v949_v30 = vpop.f32.mrf.mxu0  ;;  %v1038_v31 = vpop.f32.mrf.mxu1 }
 0x858   :  { %v1175_v43 = vmul.f32 %v1151_v32, %v1038_v31  ;;  %v1173_v46 = vmul.f32 %v1149_v35, %v949_v30  ;;  %v1190_v52 = vadd.f32 %v1172_v34, %v1166_v40  ;;  %v1208_v14 = vadd.f32 %v1174_v56, %v1168_v5  ;;  %v1153_v32 = vld [vmem:[%s5269_s11 + $0x58] sm:$0xff]  ;;  %v1146_v34 = vld [vmem:[%s5269_s11 + $0x20] sm:$0xff] }
 0x859   :  { %v953_v37 = vpop.f32.mrf.mxu0  ;;  %v1042_v38 = vpop.f32.mrf.mxu1  ;;  %v1158_v40 = vld [vmem:[%s5269_s11 + $0x80] sm:$0xff] }
 0x85a   :  { %v1178_v44 = vmul.f32 %v1154_v33, %v953_v37  ;;  %v1217_v62 = vadd.f32 %v1175_v43, %v1169_v51  ;;  %v1199_v6 = vadd.f32 %v1173_v46, %v1167_v55  ;;  %v1180_v7 = vmul.f32 %v1156_v53, %v1042_v38  ;;  %v1147_v38 = vld [vmem:[%s5269_s11 + $0x28] sm:$0xff] }
 0x85b   :  { %v955_v47 = vpop.f32.mrf.mxu0  ;;  %v1044_v48 = vpop.f32.mrf.mxu1 }
 0x85c   :  { %v1181_v54 = vmul.f32 %v1157_v39, %v1044_v48  ;;  %v1179_v57 = vmul.f32 %v1155_v45, %v955_v47  ;;  %v1191_v63 = vadd.f32 %v1190_v52, %v1178_v44  ;;  %v1209_v22 = vadd.f32 %v1208_v14, %v1180_v7  ;;  %v1159_v44 = vld [vmem:[%s5269_s11 + $0x88] sm:$0xff]  ;;  %v1164_v52 = vld [vmem:[%s5269_s11 + $0xb0] sm:$0xff] }
 0x85d   :  { %v959_v58 = vpop.f32.mrf.mxu0  ;;  %v1048_v59 = vpop.f32.mrf.mxu1 }
 0x85e   :  { %v1184_v3 = vmul.f32 %v1160_v49, %v959_v58  ;;  %v1218_v10 = vadd.f32 %v1217_v62, %v1181_v54  ;;  %v1200_v15 = vadd.f32 %v1199_v6, %v1179_v57  ;;  %v1186_v16 = vmul.f32 %v1162_v4, %v1048_v59  ;;  %v1165_v59 = vld [vmem:[%s5269_s11 + $0xb8] sm:$0xff] }
 0x85f   :  { %v961_v8 = vpop.f32.mrf.mxu0  ;;  %v1050_v9 = vpop.f32.mrf.mxu1 }
 0x860   :  { %v1192_v11 = vadd.f32 %v1191_v63, %v1184_v3  ;;  %v1185_v12 = vmul.f32 %v1161_v60, %v961_v8  ;;  %v1187_v13 = vmul.f32 %v1163_v61, %v1050_v9  ;;  %v1210_v23 = vadd.f32 %v1209_v22, %v1186_v16 }
 0x861   :  { %v1119_v17 = vpop.f32.mrf.mxu0 }
 0x862   :  { %v1193_v18 = vrot.slane %v1192_v11, 4  ;;  %v1219_v19 = vadd.f32 %v1218_v10, %v1187_v13  ;;  %v1201_v24 = vadd.f32 %v1200_v15, %v1185_v12  ;;  %v1211_v41 = vrot.slane %v1210_v23, 4 }
 0x863   :  { %v1121_v25 = vpop.f32.mrf.mxu0  ;;  %v1170_v47 = vmul.f32 %v1146_v34, %v1119_v17 }
 0x864   :  { %v1194_v26 = vadd.f32 %v1193_v18, %v1192_v11  ;;  %v1220_v27 = vrot.slane %v1219_v19, 4  ;;  %v1202_v33 = vrot.slane %v1201_v24, 4  ;;  %v1171_v49 = vmul.f32 %v1147_v38, %v1121_v25  ;;  %v4936_v38 = vld [vmem:[%s5271_s13 + $0x8] sm:$0xff] }
 0x865   :  { %v1125_v28 = vpop.f32.mrf.mxu0  ;;  %v1212_v56 = vadd.f32 %v1211_v41, %v1210_v23 }
 0x866   :  { %v1195_v30 = vrot.slane %v1194_v26, 2  ;;  %v1221_v31 = vadd.f32 %v1220_v27, %v1219_v19  ;;  %v1176_v39 = vmul.f32 %v1152_v29, %v1125_v28  ;;  %v1203_v48 = vadd.f32 %v1202_v33, %v1201_v24 }
 0x867   :  { %v1127_v35 = vpop.f32.mrf.mxu0  ;;  %v1213_v9 = vrot.slane %v1212_v56, 2 }
 0x868   :  { %v1196_v36 = vadd.f32 %v1195_v30, %v1194_v26  ;;  %v1222_v37 = vrot.slane %v1221_v31, 2  ;;  %v1177_v42 = vmul.f32 %v1153_v32, %v1127_v35  ;;  %v1226_v54 = vadd.f32 %v1176_v39, %v1170_v47  ;;  %v4919_v35 = vld [vmem:[%s5271_s13 + $0x18] sm:$0xff]  ;;  %v4943_v39 = vld [vmem:[%s5271_s13] sm:$0xff] }
 0x869   :  { %v1131_v43 = vpop.f32.mrf.mxu0  ;;  %v1204_v3 = vrot.slane %v1203_v48, 2  ;;  %v1214_v15 = vadd.f32 %v1213_v9, %v1212_v56 }
 0x86a   :  { %v1197_v45 = vrot.slane %v1196_v36, 1  ;;  %v1223_v46 = vadd.f32 %v1222_v37, %v1221_v31  ;;  %v1182_v50 = vmul.f32 %v1158_v40, %v1131_v43  ;;  %v1235_v57 = vadd.f32 %v1177_v42, %v1171_v49  ;;  %v4927_v37 = vld [vmem:[%s5271_s13 + $0x10] sm:$0xff] }
 0x86b   :  { %v1133_v51 = vpop.f32.mrf.mxu0  ;;  %v1205_v12 = vadd.f32 %v1204_v3, %v1203_v48  ;;  %v1215_v24 = vrot.slane %v1214_v15, 1 }
 0x86c   :  { %v1224_v53 = vrot.slane %v1223_v46, 1  ;;  %v1183_v55 = vmul.f32 %v1159_v44, %v1133_v51  ;;  %v1227_v60 = vadd.f32 %v1226_v54, %v1182_v50  ;;  %v1198_v62 = vadd.f32 %v1197_v45, %v1196_v36 }
 0x86d   :  { %v1137_v58 = vpop.f32.mrf.mxu0  ;;  %v1206_v18 = vrot.slane %v1205_v12, 1  ;;  %v1216_v30 = vadd.f32 %v1215_v24, %v1214_v15 }
 0x86e   :  { %v1188_v61 = vmul.f32 %v1164_v52, %v1137_v58  ;;  %v1225_v63 = vadd.f32 %v1224_v53, %v1223_v46  ;;  %v1236_v5 = vadd.f32 %v1235_v57, %v1183_v55  ;;  %v4973_v52 = vld [vmem:[%s5272_s14] ss:$0 sm:$0xff]  ;;  %s4206_s14 = smov 96  }
 0x86f   :  { %v1139_v4 = vpop.f32.mrf.mxu0  ;;  %v1207_v23 = vadd.f32 %v1206_v18, %v1205_v12 }
 0x870   :  { %v1228_v6 = vadd.f32 %v1227_v60, %v1188_v61  ;;  %v1189_v7 = vmul.f32 %v1165_v59, %v1139_v4  ;;  %v4846_v8 = vsel %vm1244_vm14, %v1198_v62, %v1225_v63 }
 0x871   :  { %1411 = vrot.lane.b32.xlu0 %v4846_v8, %s4204_s18  ;;  %3794 = vmatmul.mubr.msk.f32.vlgmr.msra.gmra.mxu1 %vm1263_vm15, %v4846_v8 }
 0x872   :  { %v1229_v10 = vrot.slane %v1228_v6, 4  ;;  %v1237_v11 = vadd.f32 %v1236_v5, %v1189_v7  ;;  %3808 = vmatpush3.msra.mxu1 %v4736_v1  ;;  %3815 = vmatprep.mubr.msk.f32.mxu1 %vm4203_vm13, %v4196_v2 }
 0x873   :  { %3809 = vmatprep.subr.mxu1 %v4196_v2 }
 0x874   :  { %v1230_v13 = vadd.f32 %v1229_v10, %v1228_v6  ;;  %v1238_v14 = vrot.slane %v1237_v11, 4  ;;  %3810 = vmatpush3.msra.mxu1 %v4744_v20 }
 0x875   :  { %3811 = vmatprep.subr.mxu1 %v4196_v2 }
 0x876   :  { %v1231_v16 = vrot.slane %v1230_v13, 2  ;;  %v1239_v17 = vadd.f32 %v1238_v14, %v1237_v11  ;;  %3812 = vmatpush3.msra.mxu1 %v4753_v0 }
 0x877   :  { %3813 = vmatprep.subr.mxu1 %v4196_v2 }
 0x878   :  { %v1232_v19 = vadd.f32 %v1231_v16, %v1230_v13  ;;  %v1240_v22 = vrot.slane %v1239_v17, 2  ;;  %3814 = vmatpush3.msra.mxu1 %v4762_v21 }
 0x879   :  { %3829 = vmatprep.subr.mxu1 %v4196_v2 }
 0x87a   :  { %v1233_v25 = vrot.slane %v1232_v19, 1  ;;  %v1241_v26 = vadd.f32 %v1240_v22, %v1239_v17 }
 0x87c   :  { %v1242_v27 = vrot.slane %v1241_v26, 1  ;;  %v1234_v28 = vadd.f32 %v1233_v25, %v1232_v19 }
 0x87e   :  { %v4863_v29 = vsel %vm1244_vm14, %v1207_v23, %v1234_v28  ;;  %v1243_v31 = vadd.f32 %v1242_v27, %v1241_v26 }
 0x87f   :  { %1706 = vrot.lane.b32.xlu1 %v4863_v29, %s4204_s18 }
 0x880   :  { %v4868_v32 = vsel %vm1244_vm14, %v1216_v30, %v1243_v31 }
 0x881   :  { %2001 = vrot.lane.b32.xlu0 %v4868_v32, %s4204_s18 }
 0x8e3   :  { %v1412_v33 = vpop.permute.xlu0 %1411 }
 0x8e4   :  { %3816 = vmatmul.mubr.msk.f32.vlgmr.msra.gmra.mxu1 %vm1263_vm15, %v1412_v33 }
 0x8e5   :  { %3830 = vmatpush3.msra.mxu1 %v4736_v1  ;;  %3837 = vmatprep.mubr.msk.f32.mxu1 %vm4203_vm13, %v4196_v2 }
 0x8e6   :  { %3831 = vmatprep.subr.mxu1 %v4196_v2 }
 0x8e7   :  { %3832 = vmatpush3.msra.mxu1 %v4744_v20 }
 0x8e8   :  { %3833 = vmatprep.subr.mxu1 %v4196_v2 }
 0x8e9   :  { %3834 = vmatpush3.msra.mxu1 %v4753_v0 }
 0x8ea   :  { %3835 = vmatprep.subr.mxu1 %v4196_v2 }
 0x8eb   :  { %3836 = vmatpush3.msra.mxu1 %v4762_v21 }
 0x8ec   :  { %3838 = vmatmul.mubr.msk.f32.vlgmr.msra.gmra.mxu1 %vm1263_vm15, %v4863_v29  ;;  %3851 = vmatprep.subr.mxu1 %v4196_v2 }
 0x8ed   :  { %3852 = vmatpush3.msra.mxu1 %v4736_v1  ;;  %3859 = vmatprep.mubr.msk.f32.mxu1 %vm4203_vm13, %v4196_v2 }
 0x8ee   :  { %3853 = vmatprep.subr.mxu1 %v4196_v2 }
 0x8ef   :  { %3854 = vmatpush3.msra.mxu1 %v4744_v20 }
 0x8f0   :  { %3855 = vmatprep.subr.mxu1 %v4196_v2 }
 0x8f1   :  { %3856 = vmatpush3.msra.mxu1 %v4753_v0  ;;  %v1707_v34 = vpop.permute.xlu1 %1706 }
 0x8f2   :  { %3857 = vmatprep.subr.mxu1 %v4196_v2 }
 0x8f3   :  { %3858 = vmatpush3.msra.mxu1 %v4762_v21  ;;  %v2002_v36 = vpop.permute.xlu0 %2001 }
 0x8f4   :  { %3860 = vmatmul.mubr.msk.f32.vlgmr.msra.gmra.mxu1 %vm1263_vm15, %v1707_v34  ;;  %3873 = vmatprep.subr.mxu1 %v4196_v2 }
 0x8f5   :  { %3874 = vmatpush3.msra.mxu1 %v4736_v1  ;;  %3881 = vmatprep.mubr.msk.f32.mxu1 %vm4203_vm13, %v4196_v2 }
 0x8f6   :  { %3875 = vmatprep.subr.mxu1 %v4196_v2 }
 0x8f7   :  { %3876 = vmatpush3.msra.mxu1 %v4744_v20 }
 0x8f8   :  { %3877 = vmatprep.subr.mxu1 %v4196_v2 }
 0x8f9   :  { %3878 = vmatpush3.msra.mxu1 %v4753_v0 }
 0x8fa   :  { %3879 = vmatprep.subr.mxu1 %v4196_v2 }
 0x8fb   :  { %3880 = vmatpush3.msra.mxu1 %v4762_v21 }
 0x8fc   :  { %3882 = vmatmul.mubr.msk.f32.vlgmr.msra.gmra.mxu1 %vm1263_vm15, %v4868_v32  ;;  %3895 = vmatprep.subr.mxu1 %v4196_v2 }
 0x8fd   :  { %3896 = vmatpush3.msra.mxu1 %v4736_v1  ;;  %3903 = vmatprep.mubr.msk.f32.mxu1 %vm4203_vm13, %v4196_v2 }
 0x8fe   :  { %3897 = vmatprep.subr.mxu1 %v4196_v2 }
 0x8ff   :  { %3898 = vmatpush3.msra.mxu1 %v4744_v20 }
 0x900   :  { %3899 = vmatprep.subr.mxu1 %v4196_v2 }
 0x901   :  { %3900 = vmatpush3.msra.mxu1 %v4753_v0 }
 0x902   :  { %3901 = vmatprep.subr.mxu1 %v4196_v2 }
 0x903   :  { %3902 = vmatpush3.msra.mxu1 %v4762_v21 }
 0x904   :  { %3904 = vmatmul.mubr.msk.f32.vlgmr.msra.gmra.mxu1 %vm1263_vm15, %v2002_v36  ;;  %3917 = vmatprep.subr.mxu1 %v4196_v2 }
 0x905   :  { %3918 = vmatpush3.msra.mxu1 %v4919_v35  ;;  %3925 = vmatprep.mubr.msk.f32.mxu1 %vm4203_vm13, %v4196_v2 }
 0x906   :  { %3919 = vmatprep.subr.mxu1 %v4196_v2 }
 0x907   :  { %3920 = vmatpush3.msra.mxu1 %v4927_v37 }
 0x908   :  { %3921 = vmatprep.subr.mxu1 %v4196_v2 }
 0x909   :  { %3922 = vmatpush3.msra.mxu1 %v4936_v38 }
 0x90a   :  { %3923 = vmatprep.subr.mxu1 %v4196_v2 }
 0x90b   :  { %3924 = vmatpush3.msra.mxu1 %v4943_v39 }
 0x90c   :  { %3926 = vmatmul.mubr.f32.vlgmr.msra.gmra.mxu1 %v4196_v2  ;;  %3939 = vmatprep.subr.mxu1 %v4196_v2 }
 0x90d   :  { %3940 = vmatpush3.msra.mxu1 %v4919_v35  ;;  %3947 = vmatprep.mubr.msk.f32.mxu1 %vm4203_vm13, %v4196_v2 }
 0x90e   :  { %3941 = vmatprep.subr.mxu1 %v4196_v2 }
 0x90f   :  { %3942 = vmatpush3.msra.mxu1 %v4927_v37 }
 0x910   :  { %3943 = vmatprep.subr.mxu1 %v4196_v2 }
 0x911   :  { %3944 = vmatpush3.msra.mxu1 %v4936_v38 }
 0x912   :  { %3945 = vmatprep.subr.mxu1 %v4196_v2 }
 0x913   :  { %3946 = vmatpush3.msra.mxu1 %v4943_v39 }
 0x914   :  { %3961 = vmatprep.subr.mxu1 %v4196_v2 }
 0x931   :  { %v1333_v40 = vpop.f32.mrf.mxu1 }
 0x932   :  { %v1334_v53 = vadd.f32 %v4973_v52, %v1333_v40 }
 0x933   :  { %v3795_v41 = vpop.f32.mrf.mxu1 }
 0x9a4   :  { %v4960_v42 = vpop.f32.mrf.mxu1 }
 0x9a6   :  { %v3817_v43 = vpop.f32.mrf.mxu1 }
 0x9ac   :  { %v4962_v44 = vpop.f32.mrf.mxu1 }
 0x9ae   :  { %v3839_v45 = vpop.f32.mrf.mxu1 }
 0x9b4   :  { %v4964_v46 = vpop.f32.mrf.mxu1 }
 0x9b6   :  { %v3861_v47 = vpop.f32.mrf.mxu1 }
 0x9bc   :  { %v4966_v48 = vpop.f32.mrf.mxu1 }
 0x9be   :  { %v3883_v49 = vpop.f32.mrf.mxu1 }
 0x9c4   :  { %v4968_v50 = vpop.f32.mrf.mxu1 }
 0x9c6   :  { %v3905_v51 = vpop.f32.mrf.mxu1 }
 0x9cc   :  { %v2218_v54 = vpop.f32.mrf.mxu1 }
 0x9cd   :  { %v2222_v55 = vadd.f32 %v2218_v54, %v1334_v53  ;;  %v1482_v54 = vadd.f32 %v4973_v52, %v4960_v42 }
 0x9ce   :  { %v3927_v56 = vpop.f32.mrf.mxu1 }
 0x9cf   :  { %4076 = vtanh.f32 %v2222_v55  ;;  %v3494_v58 = vmul.f32 -1.442695, %v2222_v55 }
 0x9d1   :  { %4078 = vpow2.f32 %v3494_v58 }
 0x9dc   :  { %v4077_v57 = vpop.eup %4076 }
 0x9dd   :  { %2232 = vrot.lane.b32.xlu1 %v4077_v57, %s4205_s1 }
 0x9de   :  { %v4079_v59 = vpop.eup %4078 }
 0x9df   :  { %v2226_v60 = vadd.f32 1.0, %v4079_v59 }
 0x9e1   :  { %4080 = vrcp.f32 %v2226_v60 }
 0x9ee   :  { %v4081_v61 = vpop.eup %4080 }
 0x9ef   :  { %v2230_v3 = vmul.f32 0.0, %v4081_v61 }
 0xa4f   :  { %v2233_v62 = vpop.permute.xlu1 %2232 }
 0xa50   :  { %v2235_v63 = vmul.f32 %v4081_v61, %v2233_v62 }
 0xa52   :  { %2237 = vrot.lane.b32.xlu0 %v2235_v63, %s4205_s1 }
 0xa56   :  { %1337 = vrot.lane.b32.xlu0 %v4846_v8, %s4206_s14 }
 0xa5a   :  { %1632 = vrot.lane.b32.xlu0 %v4863_v29, %s4206_s14 }
 0xa5e   :  { %1927 = vrot.lane.b32.xlu0 %v4868_v32, %s4206_s14 }
 0xac4   :  { %v2238_v4 = vpop.permute.xlu0 %2237 }
 0xac5   :  { %v4981_v5 = vadd.f32 %v2238_v4, %v2230_v3 }
 0xac7   :  { %4082 = vtanh.f32 %v4981_v5 }
 0xac8   :  { %v1338_v6 = vpop.permute.xlu0 %1337 }
 0xac9   :  { %3805 = vmatmul.mubr.msk.f32.vlgmr.msra.gmra.mxu0 %vm1263_vm15, %v1338_v6 }
 0xaca   :  { %3819 = vmatpush3.msra.mxu0 %v4736_v1  ;;  %3826 = vmatprep.mubr.msk.f32.mxu0 %vm4203_vm13, %v4196_v2 }
 0xacb   :  { %3820 = vmatprep.subr.mxu0 %v4196_v2 }
 0xacc   :  { %3821 = vmatpush3.msra.mxu0 %v4744_v20 }
 0xacd   :  { %3822 = vmatprep.subr.mxu0 %v4196_v2 }
 0xace   :  { %3823 = vmatpush3.msra.mxu0 %v4753_v0 }
 0xacf   :  { %3824 = vmatprep.subr.mxu0 %v4196_v2 }
 0xad0   :  { %3825 = vmatpush3.msra.mxu0 %v4762_v21 }
 0xad1   :  { %3840 = vmatprep.subr.mxu0 %v4196_v2 }
 0xad4   :  { %v4083_v7 = vpop.eup %4082 }
 0xad5   :  { %2243 = vrot.lane.b32.xlu1 %v4083_v7, %s4205_s1 }
 0xad9   :  { %1485 = vrot.lane.b32.xlu1 %v4846_v8, %s4205_s1  ;;  %v1633_v8 = vpop.permute.xlu0 %1632 }
 0xadd   :  { %1780 = vrot.lane.b32.xlu1 %v4863_v29, %s4205_s1  ;;  %v1928_v13 = vpop.permute.xlu0 %1927 }
 0xae1   :  { %2075 = vrot.lane.b32.xlu1 %v4868_v32, %s4205_s1 }
 0xb47   :  { %v2244_v9 = vpop.permute.xlu1 %2243 }
 0xb48   :  { %v2246_v10 = vmul.f32 %v4081_v61, %v2244_v9 }
 0xb4a   :  { %2248 = vrot.lane.b32.xlu0 %v2246_v10, %s4204_s18 }
 0xb4b   :  { %v1486_v11 = vpop.permute.xlu1 %1485 }
 0xb4c   :  { %3827 = vmatmul.mubr.msk.f32.vlgmr.msra.gmra.mxu0 %vm1263_vm15, %v1486_v11 }
 0xb4d   :  { %3841 = vmatpush3.msra.mxu0 %v4736_v1  ;;  %3848 = vmatprep.mubr.msk.f32.mxu0 %vm4203_vm13, %v4196_v2 }
 0xb4e   :  { %3842 = vmatprep.subr.mxu0 %v4196_v2 }
 0xb4f   :  { %3843 = vmatpush3.msra.mxu0 %v4744_v20  ;;  %v1781_v12 = vpop.permute.xlu1 %1780 }
 0xb50   :  { %3844 = vmatprep.subr.mxu0 %v4196_v2 }
 0xb51   :  { %3845 = vmatpush3.msra.mxu0 %v4753_v0 }
 0xb52   :  { %3846 = vmatprep.subr.mxu0 %v4196_v2 }
 0xb53   :  { %3847 = vmatpush3.msra.mxu0 %v4762_v21  ;;  %v2076_v14 = vpop.permute.xlu1 %2075 }
 0xb54   :  { %3849 = vmatmul.mubr.msk.f32.vlgmr.msra.gmra.mxu0 %vm1263_vm15, %v1633_v8  ;;  %3862 = vmatprep.subr.mxu0 %v4196_v2 }
 0xb55   :  { %3863 = vmatpush3.msra.mxu0 %v4736_v1  ;;  %3870 = vmatprep.mubr.msk.f32.mxu0 %vm4203_vm13, %v4196_v2 }
 0xb56   :  { %3864 = vmatprep.subr.mxu0 %v4196_v2 }
 0xb57   :  { %3865 = vmatpush3.msra.mxu0 %v4744_v20 }
 0xb58   :  { %3866 = vmatprep.subr.mxu0 %v4196_v2 }
 0xb59   :  { %3867 = vmatpush3.msra.mxu0 %v4753_v0 }
 0xb5a   :  { %3868 = vmatprep.subr.mxu0 %v4196_v2 }
 0xb5b   :  { %3869 = vmatpush3.msra.mxu0 %v4762_v21 }
 0xb5c   :  { %3871 = vmatmul.mubr.msk.f32.vlgmr.msra.gmra.mxu0 %vm1263_vm15, %v1781_v12  ;;  %3884 = vmatprep.subr.mxu0 %v4196_v2 }
 0xb5d   :  { %3885 = vmatpush3.msra.mxu0 %v4736_v1  ;;  %3892 = vmatprep.mubr.msk.f32.mxu0 %vm4203_vm13, %v4196_v2 }
 0xb5e   :  { %3886 = vmatprep.subr.mxu0 %v4196_v2 }
 0xb5f   :  { %3887 = vmatpush3.msra.mxu0 %v4744_v20 }
 0xb60   :  { %3888 = vmatprep.subr.mxu0 %v4196_v2 }
 0xb61   :  { %3889 = vmatpush3.msra.mxu0 %v4753_v0 }
 0xb62   :  { %3890 = vmatprep.subr.mxu0 %v4196_v2 }
 0xb63   :  { %3891 = vmatpush3.msra.mxu0 %v4762_v21 }
 0xb64   :  { %3893 = vmatmul.mubr.msk.f32.vlgmr.msra.gmra.mxu0 %vm1263_vm15, %v1928_v13  ;;  %3906 = vmatprep.subr.mxu0 %v4196_v2 }
 0xb65   :  { %3907 = vmatpush3.msra.mxu0 %v4736_v1  ;;  %3914 = vmatprep.mubr.msk.f32.mxu0 %vm4203_vm13, %v4196_v2 }
 0xb66   :  { %3908 = vmatprep.subr.mxu0 %v4196_v2 }
 0xb67   :  { %3909 = vmatpush3.msra.mxu0 %v4744_v20 }
 0xb68   :  { %3910 = vmatprep.subr.mxu0 %v4196_v2 }
 0xb69   :  { %3911 = vmatpush3.msra.mxu0 %v4753_v0 }
 0xb6a   :  { %3912 = vmatprep.subr.mxu0 %v4196_v2 }
 0xb6b   :  { %3913 = vmatpush3.msra.mxu0 %v4762_v21 }
 0xb6c   :  { %3915 = vmatmul.mubr.msk.f32.vlgmr.msra.gmra.mxu0 %vm1263_vm15, %v2076_v14  ;;  %3928 = vmatprep.subr.mxu0 %v4196_v2 }
 0xb6d   :  { %3929 = vmatpush3.msra.mxu0 %v4919_v35  ;;  %3936 = vmatprep.mubr.msk.f32.mxu0 %vm4203_vm13, %v4196_v2 }
 0xb6e   :  { %3930 = vmatprep.subr.mxu0 %v4196_v2 }
 0xb6f   :  { %3931 = vmatpush3.msra.mxu0 %v4927_v37 }
 0xb70   :  { %3932 = vmatprep.subr.mxu0 %v4196_v2 }
 0xb71   :  { %3933 = vmatpush3.msra.mxu0 %v4936_v38 }
 0xb72   :  { %3934 = vmatprep.subr.mxu0 %v4196_v2 }
 0xb73   :  { %3935 = vmatpush3.msra.mxu0 %v4943_v39 }
 0xb74   :  { %3950 = vmatprep.subr.mxu0 %v4196_v2 }
 0xb89   :  { %v1407_v1 = vpop.f32.mrf.mxu0 }
 0xb8a   :  { %v1408_v27 = vadd.f32 %v4973_v52, %v1407_v1 }
 0xb8b   :  { %v3806_v20 = vpop.f32.mrf.mxu0 }
 0xbbc   :  { %v2249_v0 = vpop.permute.xlu0 %2248 }
 0xbbd   :  { %3937 = vmatmul.mubr.msk.f32.vlgmr.msra.gmra.mxu0 %vm1263_vm15, %v2249_v0 }
 0xbbe   :  { %3951 = vmatpush3.msra.mxu0 %v4919_v35  ;;  %3958 = vmatprep.mubr.msk.f32.mxu0 %vm4203_vm13, %v4196_v2 }
 0xbbf   :  { %3952 = vmatprep.subr.mxu0 %v4196_v2 }
 0xbc0   :  { %3953 = vmatpush3.msra.mxu0 %v4927_v37 }
 0xbc1   :  { %3954 = vmatprep.subr.mxu0 %v4196_v2 }
 0xbc2   :  { %3955 = vmatpush3.msra.mxu0 %v4936_v38 }
 0xbc3   :  { %3956 = vmatprep.subr.mxu0 %v4196_v2 }
 0xbc4   :  { %3957 = vmatpush3.msra.mxu0 %v4943_v39 }
 0xbc5   :  { %3972 = vmatprep.subr.mxu0 %v4196_v2 }
 0xc0c   :  { %v5069_v21 = vpop.f32.mrf.mxu0 }
 0xc0d   :  { %v1556_v11 = vadd.f32 %v4973_v52, %v5069_v21 }
 0xc0e   :  { %v3828_v15 = vpop.f32.mrf.mxu0 }
 0xc14   :  { %v5071_v16 = vpop.f32.mrf.mxu0 }
 0xc16   :  { %v3850_v17 = vpop.f32.mrf.mxu0 }
 0xc1c   :  { %v5073_v18 = vpop.f32.mrf.mxu0 }
 0xc1e   :  { %v3872_v19 = vpop.f32.mrf.mxu0 }
 0xc24   :  { %v5075_v22 = vpop.f32.mrf.mxu0 }
 0xc26   :  { %v3894_v24 = vpop.f32.mrf.mxu0 }
 0xc2c   :  { %v5077_v25 = vpop.f32.mrf.mxu0 }
 0xc2e   :  { %v3916_v26 = vpop.f32.mrf.mxu0 }
 0xc7d   :  { %v2318_v23 = vpop.f32.mrf.mxu0 }
 0xc7e   :  { %v2322_v28 = vadd.f32 %v2318_v23, %v1408_v27 }
 0xc7f   :  { %v3938_v29 = vpop.f32.mrf.mxu0 }
 0xc80   :  { %4084 = vtanh.f32 %v2322_v28  ;;  %v3496_v31 = vmul.f32 -1.442695, %v2322_v28 }
 0xc82   :  { %4086 = vpow2.f32 %v3496_v31 }
 0xc8d   :  { %v4085_v30 = vpop.eup %4084 }
 0xc8e   :  { %2332 = vrot.lane.b32.xlu1 %v4085_v30, %s4205_s1  ;;  %v1629_v30 = vadd.f32 %v4973_v52, %v4962_v44 }
 0xc8f   :  { %v4087_v32 = vpop.eup %4086 }
 0xc90   :  { %v2326_v33 = vadd.f32 1.0, %v4087_v32 }
 0xc92   :  { %4088 = vrcp.f32 %v2326_v33 }
 0xc9f   :  { %v4089_v34 = vpop.eup %4088 }
 0xca0   :  { %v2330_v41 = vmul.f32 %v4089_v34, %v4981_v5 }
 0xd00   :  { %v2333_v36 = vpop.permute.xlu1 %2332 }
 0xd01   :  { %v2335_v40 = vmul.f32 %v4089_v34, %v2333_v36 }
 0xd03   :  { %2337 = vrot.lane.b32.xlu0 %v2335_v40, %s4205_s1 }
 0xd75   :  { %v2338_v43 = vpop.permute.xlu0 %2337 }
 0xd76   :  { %v2340_v45 = vadd.f32 %v2338_v43, %v2330_v41 }
 0xd78   :  { %4090 = vtanh.f32 %v2340_v45 }
 0xd85   :  { %v4091_v47 = vpop.eup %4090 }
 0xd86   :  { %2343 = vrot.lane.b32.xlu1 %v4091_v47, %s4205_s1 }
 0xdf8   :  { %v2344_v49 = vpop.permute.xlu1 %2343 }
 0xdf9   :  { %v2346_v51 = vmul.f32 %v4089_v34, %v2344_v49 }
 0xdfb   :  { %2348 = vrot.lane.b32.xlu0 %v2346_v51, %s4204_s18 }
 0xe6d   :  { %v2349_v53 = vpop.permute.xlu0 %2348 }
 0xe6e   :  { %3948 = vmatmul.mubr.msk.f32.vlgmr.msra.gmra.mxu1 %vm1263_vm15, %v2349_v53 }
 0xe6f   :  { %3962 = vmatpush3.msra.mxu1 %v4919_v35  ;;  %3969 = vmatprep.mubr.msk.f32.mxu1 %vm4203_vm13, %v4196_v2 }
 0xe70   :  { %3963 = vmatprep.subr.mxu1 %v4196_v2 }
 0xe71   :  { %3964 = vmatpush3.msra.mxu1 %v4927_v37 }
 0xe72   :  { %3965 = vmatprep.subr.mxu1 %v4196_v2 }
 0xe73   :  { %3966 = vmatpush3.msra.mxu1 %v4936_v38 }
 0xe74   :  { %3967 = vmatprep.subr.mxu1 %v4196_v2 }
 0xe75   :  { %3968 = vmatpush3.msra.mxu1 %v4943_v39 }
 0xe76   :  { %3983 = vmatprep.subr.mxu1 %v4196_v2 }
 0xf2e   :  { %v2418_v55 = vpop.f32.mrf.mxu1 }
 0xf2f   :  { %v2422_v56 = vadd.f32 %v2418_v55, %v1482_v54 }
 0xf30   :  { %v3949_v57 = vpop.f32.mrf.mxu1 }
 0xf31   :  { %4092 = vtanh.f32 %v2422_v56  ;;  %v3498_v59 = vmul.f32 -1.442695, %v2422_v56  ;;  %v1703_v57 = vadd.f32 %v4973_v52, %v5071_v16 }
 0xf33   :  { %4094 = vpow2.f32 %v3498_v59 }
 0xf3e   :  { %v4093_v58 = vpop.eup %4092 }
 0xf3f   :  { %2432 = vrot.lane.b32.xlu1 %v4093_v58, %s4205_s1 }
 0xf40   :  { %v4095_v60 = vpop.eup %4094 }
 0xf41   :  { %v2426_v61 = vadd.f32 1.0, %v4095_v60 }
 0xf43   :  { %4096 = vrcp.f32 %v2426_v61 }
 0xf50   :  { %v4097_v62 = vpop.eup %4096 }
 0xf51   :  { %v2430_v4 = vmul.f32 %v4097_v62, %v2340_v45 }
 0xfb1   :  { %v2433_v63 = vpop.permute.xlu1 %2432 }
 0xfb2   :  { %v2435_v3 = vmul.f32 %v4097_v62, %v2433_v63 }
 0xfb4   :  { %2437 = vrot.lane.b32.xlu0 %v2435_v3, %s4205_s1 }
0x1026   :  { %v2438_v5 = vpop.permute.xlu0 %2437 }
0x1027   :  { %v2440_v42 = vadd.f32 %v2438_v5, %v2430_v4 }
0x1029   :  { %4098 = vtanh.f32 %v2440_v42 }
0x1036   :  { %v4099_v6 = vpop.eup %4098 }
0x1037   :  { %2443 = vrot.lane.b32.xlu1 %v4099_v6, %s4205_s1 }
0x10a9   :  { %v2444_v7 = vpop.permute.xlu1 %2443 }
0x10aa   :  { %v2446_v9 = vmul.f32 %v4097_v62, %v2444_v7 }
0x10ac   :  { %2448 = vrot.lane.b32.xlu0 %v2446_v9, %s4204_s18 }
0x111e   :  { %v2449_v10 = vpop.permute.xlu0 %2448 }
0x111f   :  { %3959 = vmatmul.mubr.msk.f32.vlgmr.msra.gmra.mxu0 %vm1263_vm15, %v2449_v10 }
0x1120   :  { %3973 = vmatpush3.msra.mxu0 %v4919_v35  ;;  %3980 = vmatprep.mubr.msk.f32.mxu0 %vm4203_vm13, %v4196_v2 }
0x1121   :  { %3974 = vmatprep.subr.mxu0 %v4196_v2 }
0x1122   :  { %3975 = vmatpush3.msra.mxu0 %v4927_v37 }
0x1123   :  { %3976 = vmatprep.subr.mxu0 %v4196_v2 }
0x1124   :  { %3977 = vmatpush3.msra.mxu0 %v4936_v38 }
0x1125   :  { %3978 = vmatprep.subr.mxu0 %v4196_v2 }
0x1126   :  { %3979 = vmatpush3.msra.mxu0 %v4943_v39 }
0x1127   :  { %3994 = vmatprep.subr.mxu0 %v4196_v2 }
0x11df   :  { %v2518_v8 = vpop.f32.mrf.mxu0 }
0x11e0   :  { %v2522_v12 = vadd.f32 %v2518_v8, %v1556_v11 }
0x11e1   :  { %v3960_v13 = vpop.f32.mrf.mxu0 }
0x11e2   :  { %4100 = vtanh.f32 %v2522_v12  ;;  %v3500_v1 = vmul.f32 -1.442695, %v2522_v12  ;;  %v1777_v12 = vadd.f32 %v4973_v52, %v4964_v46 }
0x11e4   :  { %4102 = vpow2.f32 %v3500_v1 }
0x11ef   :  { %v4101_v14 = vpop.eup %4100 }
0x11f0   :  { %2532 = vrot.lane.b32.xlu1 %v4101_v14, %s4205_s1 }
0x11f1   :  { %v4103_v20 = vpop.eup %4102 }
0x11f2   :  { %v2526_v0 = vadd.f32 1.0, %v4103_v20 }
0x11f4   :  { %4104 = vrcp.f32 %v2526_v0 }
0x1201   :  { %v4105_v15 = vpop.eup %4104 }
0x1202   :  { %v2530_v24 = vmul.f32 %v4105_v15, %v2440_v42 }
0x1262   :  { %v2533_v17 = vpop.permute.xlu1 %2532 }
0x1263   :  { %v2535_v19 = vmul.f32 %v4105_v15, %v2533_v17 }
0x1265   :  { %2537 = vrot.lane.b32.xlu0 %v2535_v19, %s4205_s1 }
0x12d7   :  { %v2538_v26 = vpop.permute.xlu0 %2537 }
0x12d8   :  { %v2540_v21 = vadd.f32 %v2538_v26, %v2530_v24 }
0x12da   :  { %4106 = vtanh.f32 %v2540_v21 }
0x12e7   :  { %v4107_v27 = vpop.eup %4106 }
0x12e8   :  { %2543 = vrot.lane.b32.xlu1 %v4107_v27, %s4205_s1 }
0x135a   :  { %v2544_v23 = vpop.permute.xlu1 %2543 }
0x135b   :  { %v2546_v28 = vmul.f32 %v4105_v15, %v2544_v23 }
0x135d   :  { %2548 = vrot.lane.b32.xlu0 %v2546_v28, %s4204_s18 }
0x13cf   :  { %v2549_v29 = vpop.permute.xlu0 %2548 }
0x13d0   :  { %3970 = vmatmul.mubr.msk.f32.vlgmr.msra.gmra.mxu1 %vm1263_vm15, %v2549_v29 }
0x13d1   :  { %3984 = vmatpush3.msra.mxu1 %v4919_v35  ;;  %3991 = vmatprep.mubr.msk.f32.mxu1 %vm4203_vm13, %v4196_v2 }
0x13d2   :  { %3985 = vmatprep.subr.mxu1 %v4196_v2 }
0x13d3   :  { %3986 = vmatpush3.msra.mxu1 %v4927_v37 }
0x13d4   :  { %3987 = vmatprep.subr.mxu1 %v4196_v2 }
0x13d5   :  { %3988 = vmatpush3.msra.mxu1 %v4936_v38 }
0x13d6   :  { %3989 = vmatprep.subr.mxu1 %v4196_v2 }
0x13d7   :  { %3990 = vmatpush3.msra.mxu1 %v4943_v39 }
0x13d8   :  { %4005 = vmatprep.subr.mxu1 %v4196_v2 }
0x1490   :  { %v2618_v31 = vpop.f32.mrf.mxu1 }
0x1491   :  { %v2622_v32 = vadd.f32 %v2618_v31, %v1629_v30  ;;  %v1851_v31 = vadd.f32 %v4973_v52, %v5073_v18 }
0x1492   :  { %v3971_v33 = vpop.f32.mrf.mxu1 }
0x1493   :  { %4108 = vtanh.f32 %v2622_v32  ;;  %v3502_v36 = vmul.f32 -1.442695, %v2622_v32 }
0x1495   :  { %4110 = vpow2.f32 %v3502_v36 }
0x14a0   :  { %v4109_v34 = vpop.eup %4108 }
0x14a1   :  { %2632 = vrot.lane.b32.xlu1 %v4109_v34, %s4205_s1 }
0x14a2   :  { %v4111_v40 = vpop.eup %4110 }
0x14a3   :  { %v2626_v41 = vadd.f32 1.0, %v4111_v40 }
0x14a5   :  { %4112 = vrcp.f32 %v2626_v41 }
0x14b2   :  { %v4113_v43 = vpop.eup %4112 }
0x14b3   :  { %v2630_v49 = vmul.f32 %v4113_v43, %v2540_v21 }
0x1513   :  { %v2633_v45 = vpop.permute.xlu1 %2632 }
0x1514   :  { %v2635_v47 = vmul.f32 %v4113_v43, %v2633_v45 }
0x1516   :  { %2637 = vrot.lane.b32.xlu0 %v2635_v47, %s4205_s1 }
0x1588   :  { %v2638_v51 = vpop.permute.xlu0 %2637 }
0x1589   :  { %v2640_v44 = vadd.f32 %v2638_v51, %v2630_v49 }
0x158b   :  { %4114 = vtanh.f32 %v2640_v44 }
0x1598   :  { %v4115_v53 = vpop.eup %4114 }
0x1599   :  { %2643 = vrot.lane.b32.xlu1 %v4115_v53, %s4205_s1 }
0x160b   :  { %v2644_v54 = vpop.permute.xlu1 %2643 }
0x160c   :  { %v2646_v55 = vmul.f32 %v4113_v43, %v2644_v54 }
0x160e   :  { %2648 = vrot.lane.b32.xlu0 %v2646_v55, %s4204_s18 }
0x1680   :  { %v2649_v56 = vpop.permute.xlu0 %2648 }
0x1681   :  { %3981 = vmatmul.mubr.msk.f32.vlgmr.msra.gmra.mxu0 %vm1263_vm15, %v2649_v56 }
0x1682   :  { %3995 = vmatpush3.msra.mxu0 %v4919_v35  ;;  %4002 = vmatprep.mubr.msk.f32.mxu0 %vm4203_vm13, %v4196_v2 }
0x1683   :  { %3996 = vmatprep.subr.mxu0 %v4196_v2 }
0x1684   :  { %3997 = vmatpush3.msra.mxu0 %v4927_v37 }
0x1685   :  { %3998 = vmatprep.subr.mxu0 %v4196_v2 }
0x1686   :  { %3999 = vmatpush3.msra.mxu0 %v4936_v38 }
0x1687   :  { %4000 = vmatprep.subr.mxu0 %v4196_v2 }
0x1688   :  { %4001 = vmatpush3.msra.mxu0 %v4943_v39 }
0x1689   :  { %4016 = vmatprep.subr.mxu0 %v4196_v2 }
0x1741   :  { %v2718_v58 = vpop.f32.mrf.mxu0 }
0x1742   :  { %v2722_v59 = vadd.f32 %v2718_v58, %v1703_v57  ;;  %v1924_v57 = vadd.f32 %v4973_v52, %v4966_v48 }
0x1743   :  { %v3982_v60 = vpop.f32.mrf.mxu0 }
0x1744   :  { %4116 = vtanh.f32 %v2722_v59  ;;  %v3504_v62 = vmul.f32 -1.442695, %v2722_v59 }
0x1746   :  { %4118 = vpow2.f32 %v3504_v62 }
0x1751   :  { %v4117_v61 = vpop.eup %4116 }
0x1752   :  { %2732 = vrot.lane.b32.xlu1 %v4117_v61, %s4205_s1 }
0x1753   :  { %v4119_v63 = vpop.eup %4118 }
0x1754   :  { %v2726_v3 = vadd.f32 1.0, %v4119_v63 }
0x1756   :  { %4120 = vrcp.f32 %v2726_v3 }
0x1763   :  { %v4121_v4 = vpop.eup %4120 }
0x1764   :  { %v2730_v6 = vmul.f32 %v4121_v4, %v2640_v44 }
0x17c4   :  { %v2733_v5 = vpop.permute.xlu1 %2732 }
0x17c5   :  { %v2735_v42 = vmul.f32 %v4121_v4, %v2733_v5 }
0x17c7   :  { %2737 = vrot.lane.b32.xlu0 %v2735_v42, %s4205_s1 }
0x1839   :  { %v2738_v7 = vpop.permute.xlu0 %2737 }
0x183a   :  { %v2740_v16 = vadd.f32 %v2738_v7, %v2730_v6 }
0x183c   :  { %4122 = vtanh.f32 %v2740_v16 }
0x1849   :  { %v4123_v9 = vpop.eup %4122 }
0x184a   :  { %2743 = vrot.lane.b32.xlu1 %v4123_v9, %s4205_s1 }
0x18bc   :  { %v2744_v10 = vpop.permute.xlu1 %2743 }
0x18bd   :  { %v2746_v11 = vmul.f32 %v4121_v4, %v2744_v10 }
0x18bf   :  { %2748 = vrot.lane.b32.xlu0 %v2746_v11, %s4204_s18 }
0x1931   :  { %v2749_v8 = vpop.permute.xlu0 %2748 }
0x1932   :  { %3992 = vmatmul.mubr.msk.f32.vlgmr.msra.gmra.mxu1 %vm1263_vm15, %v2749_v8  ;;  %v1998_v8 = vadd.f32 %v4973_v52, %v5075_v22 }
0x1933   :  { %4006 = vmatpush3.msra.mxu1 %v4919_v35  ;;  %4013 = vmatprep.mubr.msk.f32.mxu1 %vm4203_vm13, %v4196_v2 }
0x1934   :  { %4007 = vmatprep.subr.mxu1 %v4196_v2 }
0x1935   :  { %4008 = vmatpush3.msra.mxu1 %v4927_v37 }
0x1936   :  { %4009 = vmatprep.subr.mxu1 %v4196_v2 }
0x1937   :  { %4010 = vmatpush3.msra.mxu1 %v4936_v38 }
0x1938   :  { %4011 = vmatprep.subr.mxu1 %v4196_v2 }
0x1939   :  { %4012 = vmatpush3.msra.mxu1 %v4943_v39 }
0x193a   :  { %4027 = vmatprep.subr.mxu1 %v4196_v2 }
0x19f2   :  { %v2818_v13 = vpop.f32.mrf.mxu1 }
0x19f3   :  { %v2822_v14 = vadd.f32 %v2818_v13, %v1777_v12 }
0x19f4   :  { %v3993_v1 = vpop.f32.mrf.mxu1 }
0x19f5   :  { %4124 = vtanh.f32 %v2822_v14  ;;  %v3506_v0 = vmul.f32 -1.442695, %v2822_v14 }
0x19f7   :  { %4126 = vpow2.f32 %v3506_v0 }
0x1a02   :  { %v4125_v20 = vpop.eup %4124 }
0x1a03   :  { %2832 = vrot.lane.b32.xlu1 %v4125_v20, %s4205_s1 }
0x1a04   :  { %v4127_v15 = vpop.eup %4126 }
0x1a05   :  { %v2826_v17 = vadd.f32 1.0, %v4127_v15 }
0x1a07   :  { %4128 = vrcp.f32 %v2826_v17 }
0x1a14   :  { %v4129_v19 = vpop.eup %4128 }
0x1a15   :  { %v2830_v21 = vmul.f32 %v4129_v19, %v2740_v16 }
0x1a75   :  { %v2833_v24 = vpop.permute.xlu1 %2832 }
0x1a76   :  { %v2835_v26 = vmul.f32 %v4129_v19, %v2833_v24 }
0x1a78   :  { %2837 = vrot.lane.b32.xlu0 %v2835_v26, %s4205_s1 }
0x1aea   :  { %v2838_v27 = vpop.permute.xlu0 %2837 }
0x1aeb   :  { %v2840_v46 = vadd.f32 %v2838_v27, %v2830_v21  ;;  %v2072_v27 = vadd.f32 %v4973_v52, %v4968_v50 }
0x1aed   :  { %4130 = vtanh.f32 %v2840_v46 }
0x1afa   :  { %v4131_v23 = vpop.eup %4130 }
0x1afb   :  { %2843 = vrot.lane.b32.xlu1 %v4131_v23, %s4205_s1 }
0x1b6d   :  { %v2844_v28 = vpop.permute.xlu1 %2843 }
0x1b6e   :  { %v2846_v29 = vmul.f32 %v4129_v19, %v2844_v28 }
0x1b70   :  { %2848 = vrot.lane.b32.xlu0 %v2846_v29, %s4204_s18 }
0x1be2   :  { %v2849_v30 = vpop.permute.xlu0 %2848 }
0x1be3   :  { %4003 = vmatmul.mubr.msk.f32.vlgmr.msra.gmra.mxu0 %vm1263_vm15, %v2849_v30 }
0x1be4   :  { %4017 = vmatpush3.msra.mxu0 %v4919_v35  ;;  %4024 = vmatprep.mubr.msk.f32.mxu0 %vm4203_vm13, %v4196_v2 }
0x1be5   :  { %4018 = vmatprep.subr.mxu0 %v4196_v2 }
0x1be6   :  { %4019 = vmatpush3.msra.mxu0 %v4927_v37 }
0x1be7   :  { %4020 = vmatprep.subr.mxu0 %v4196_v2 }
0x1be8   :  { %4021 = vmatpush3.msra.mxu0 %v4936_v38 }
0x1be9   :  { %4022 = vmatprep.subr.mxu0 %v4196_v2 }
0x1bea   :  { %4023 = vmatpush3.msra.mxu0 %v4943_v39 }
0x1beb   :  { %4038 = vmatprep.subr.mxu0 %v4196_v2 }
0x1ca3   :  { %v2918_v32 = vpop.f32.mrf.mxu0 }
0x1ca4   :  { %v2922_v33 = vadd.f32 %v2918_v32, %v1851_v31 }
0x1ca5   :  { %v4004_v34 = vpop.f32.mrf.mxu0 }
0x1ca6   :  { %4132 = vtanh.f32 %v2922_v33  ;;  %v3508_v40 = vmul.f32 -1.442695, %v2922_v33 }
0x1ca8   :  { %4134 = vpow2.f32 %v3508_v40 }
0x1cb3   :  { %v4133_v36 = vpop.eup %4132 }
0x1cb4   :  { %2932 = vrot.lane.b32.xlu1 %v4133_v36, %s4205_s1 }
0x1cb5   :  { %v4135_v41 = vpop.eup %4134 }
0x1cb6   :  { %v2926_v43 = vadd.f32 1.0, %v4135_v41 }
0x1cb8   :  { %4136 = vrcp.f32 %v2926_v43 }
0x1cc5   :  { %v4137_v45 = vpop.eup %4136 }
0x1cc6   :  { %v2930_v51 = vmul.f32 %v4137_v45, %v2840_v46 }
0x1d26   :  { %v2933_v47 = vpop.permute.xlu1 %2932 }
0x1d27   :  { %v2935_v49 = vmul.f32 %v4137_v45, %v2933_v47 }
0x1d29   :  { %2937 = vrot.lane.b32.xlu0 %v2935_v49, %s4205_s1 }
0x1d9b   :  { %v2938_v44 = vpop.permute.xlu0 %2937 }
0x1d9c   :  { %v2940_v18 = vadd.f32 %v2938_v44, %v2930_v51  ;;  %v2146_v51 = vadd.f32 %v4973_v52, %v5077_v25  ;;  %v3350_v25 = vld [vmem:[%s5273_s15 + $0x18] sm:$0xff] }
0x1d9e   :  { %4138 = vtanh.f32 %v2940_v18 }
0x1dab   :  { %v4139_v53 = vpop.eup %4138 }
0x1dac   :  { %2943 = vrot.lane.b32.xlu1 %v4139_v53, %s4205_s1 }
0x1e1e   :  { %v2944_v54 = vpop.permute.xlu1 %2943 }
0x1e1f   :  { %v2946_v55 = vmul.f32 %v4137_v45, %v2944_v54 }
0x1e21   :  { %2948 = vrot.lane.b32.xlu0 %v2946_v55, %s4204_s18 }
0x1e93   :  { %v2949_v56 = vpop.permute.xlu0 %2948 }
0x1e94   :  { %4014 = vmatmul.mubr.msk.f32.vlgmr.msra.gmra.mxu1 %vm1263_vm15, %v2949_v56 }
0x1e95   :  { %4028 = vmatpush3.msra.mxu1 %v4919_v35  ;;  %4035 = vmatprep.mubr.msk.f32.mxu1 %vm4203_vm13, %v4196_v2 }
0x1e96   :  { %4029 = vmatprep.subr.mxu1 %v4196_v2 }
0x1e97   :  { %4030 = vmatpush3.msra.mxu1 %v4927_v37 }
0x1e98   :  { %4031 = vmatprep.subr.mxu1 %v4196_v2 }
0x1e99   :  { %4032 = vmatpush3.msra.mxu1 %v4936_v38 }
0x1e9a   :  { %4033 = vmatprep.subr.mxu1 %v4196_v2 }
0x1e9b   :  { %4034 = vmatpush3.msra.mxu1 %v4943_v39 }
0x1e9c   :  { %4049 = vmatprep.subr.mxu1 %v4196_v2 }
0x1f54   :  { %v3018_v58 = vpop.f32.mrf.mxu1 }
0x1f55   :  { %v3022_v59 = vadd.f32 %v3018_v58, %v1924_v57 }
0x1f56   :  { %v4015_v60 = vpop.f32.mrf.mxu1 }
0x1f57   :  { %4140 = vtanh.f32 %v3022_v59  ;;  %v3510_v62 = vmul.f32 -1.442695, %v3022_v59 }
0x1f59   :  { %4142 = vpow2.f32 %v3510_v62 }
0x1f64   :  { %v4141_v61 = vpop.eup %4140 }
0x1f65   :  { %3032 = vrot.lane.b32.xlu1 %v4141_v61, %s4205_s1 }
0x1f66   :  { %v4143_v63 = vpop.eup %4142 }
0x1f67   :  { %v3026_v3 = vadd.f32 1.0, %v4143_v63  ;;  %v3349_v63 = vld [vmem:[%s5273_s15 + $0x10] sm:$0xff] }
0x1f69   :  { %4144 = vrcp.f32 %v3026_v3  ;;  %v3348_v3 = vld [vmem:[%s5273_s15 + $0x8] sm:$0xff] }
0x1f76   :  { %v4145_v4 = vpop.eup %4144 }
0x1f77   :  { %v3030_v6 = vmul.f32 %v4145_v4, %v2940_v18 }
0x1fd7   :  { %v3033_v5 = vpop.permute.xlu1 %3032 }
0x1fd8   :  { %v3035_v42 = vmul.f32 %v4145_v4, %v3033_v5 }
0x1fda   :  { %3037 = vrot.lane.b32.xlu0 %v3035_v42, %s4205_s1 }
0x204c   :  { %v3038_v7 = vpop.permute.xlu0 %3037 }
0x204d   :  { %v3040_v48 = vadd.f32 %v3038_v7, %v3030_v6 }
0x204f   :  { %4146 = vtanh.f32 %v3040_v48 }
0x205c   :  { %v4147_v16 = vpop.eup %4146 }
0x205d   :  { %3043 = vrot.lane.b32.xlu1 %v4147_v16, %s4205_s1 }
0x20cf   :  { %v3044_v9 = vpop.permute.xlu1 %3043 }
0x20d0   :  { %v3046_v10 = vmul.f32 %v4145_v4, %v3044_v9  ;;  %v3347_v4 = vld [vmem:[%s5273_s15] sm:$0xff]  ;;  %s3441_s15 = sshll.u32 %s4207_s6, 4  ;;  %s3442_s15 = int_to_ptr.vmem [resolvable:$true] %s3441_s15 }
0x20d1   :  { %s4172_s5 = scalar_lea.vmem %s3442_s15, 32  ;;  %p4177_p1 = scmp.lt.s32.totalorder %s3442_s15, %s3442_s15 }
0x20d2   :  { %3048 = vrot.lane.b32.xlu0 %v3046_v10, %s4204_s18  ;;  %p4173_p0 = scmp.ne.s32.totalorder %s3442_s15, %s4172_s5  ;;  %p4178_p2 = scmp.lt.s32.totalorder %s4172_s5, %s4172_s5 }
0x20d4   :  { %p4179_p3 = por %p4178_p2, %p4177_p1 }
0x20d6   :  { %p4180_p4 = pnand %p4179_p3, %p4173_p0 }
0x2144   :  { %v3049_v11 = vpop.permute.xlu0 %3048 }
0x2145   :  { %4025 = vmatmul.mubr.msk.f32.vlgmr.msra.gmra.mxu0 %vm1263_vm15, %v3049_v11 }
0x2146   :  { %4039 = vmatpush3.msra.mxu0 %v4919_v35  ;;  %4046 = vmatprep.mubr.msk.f32.mxu0 %vm4203_vm13, %v4196_v2 }
0x2147   :  { %4040 = vmatprep.subr.mxu0 %v4196_v2 }
0x2148   :  { %4041 = vmatpush3.msra.mxu0 %v4927_v37 }
0x2149   :  { %4042 = vmatprep.subr.mxu0 %v4196_v2 }
0x214a   :  { %4043 = vmatpush3.msra.mxu0 %v4936_v38 }
0x214b   :  { %4044 = vmatprep.subr.mxu0 %v4196_v2 }
0x214c   :  { %4045 = vmatpush3.msra.mxu0 %v4943_v39 }
0x2205   :  { %v3118_v12 = vpop.f32.mrf.mxu0 }
0x2206   :  { %v3122_v35 = vadd.f32 %v3118_v12, %v1998_v8 }
0x2207   :  { %v4026_v13 = vpop.f32.mrf.mxu0 }
0x2208   :  { %4148 = vtanh.f32 %v3122_v35  ;;  %v3512_v1 = vmul.f32 -1.442695, %v3122_v35 }
0x220a   :  { %4150 = vpow2.f32 %v3512_v1 }
0x2215   :  { %v4149_v14 = vpop.eup %4148 }
0x2216   :  { %3132 = vrot.lane.b32.xlu1 %v4149_v14, %s4205_s1 }
0x2217   :  { %v4151_v37 = vpop.eup %4150 }
0x2218   :  { %v3126_v20 = vadd.f32 1.0, %v4151_v37 }
0x221a   :  { %4152 = vrcp.f32 %v3126_v20 }
0x2227   :  { %v4153_v38 = vpop.eup %4152 }
0x2228   :  { %v3130_v39 = vmul.f32 %v4153_v38, %v3040_v48  ;;  %v3517_v48 = vld [vmem:[%s5274_s16] ss:$0 sm:$0xff] }
0x2288   :  { %v3133_v0 = vpop.permute.xlu1 %3132 }
0x2289   :  { %v3135_v15 = vmul.f32 %v4153_v38, %v3133_v0 }
0x228b   :  { %3137 = vrot.lane.b32.xlu0 %v3135_v15, %s4205_s1 }
0x22fd   :  { %v3138_v17 = vpop.permute.xlu0 %3137 }
0x22fe   :  { %v3140_v22 = vadd.f32 %v3138_v17, %v3130_v39 }
0x2300   :  { %4154 = vtanh.f32 %v3140_v22 }
0x230d   :  { %v4155_v19 = vpop.eup %4154 }
0x230e   :  { %3143 = vrot.lane.b32.xlu1 %v4155_v19, %s4205_s1 }
0x2380   :  { %v3144_v24 = vpop.permute.xlu1 %3143 }
0x2381   :  { %v3146_v26 = vmul.f32 %v4153_v38, %v3144_v24 }
0x2383   :  { %3148 = vrot.lane.b32.xlu0 %v3146_v26, %s4204_s18 }
0x23f5   :  { %v3149_v21 = vpop.permute.xlu0 %3148 }
0x23f6   :  { %4036 = vmatmul.mubr.msk.f32.vlgmr.msra.gmra.mxu1 %vm1263_vm15, %v3149_v21 }
0x23f7   :  { %4057 = vmatprep.mubr.msk.f32.mxu1 %vm4203_vm13, %v4196_v2  ;;  %4050 = vmatpush3.msra.mxu1 %v3350_v25 }
0x23f8   :  { %4051 = vmatprep.subr.mxu1 %v4196_v2 }
0x23f9   :  { %4052 = vmatpush3.msra.mxu1 %v3349_v63 }
0x23fa   :  { %4053 = vmatprep.subr.mxu1 %v4196_v2 }
0x23fb   :  { %4054 = vmatpush3.msra.mxu1 %v3348_v3 }
0x23fc   :  { %4055 = vmatprep.subr.mxu1 %v4196_v2 }
0x23fd   :  { %4056 = vmatpush3.msra.mxu1 %v3347_v4 }
0x24b6   :  { %v3218_v46 = vpop.f32.mrf.mxu1 }
0x24b7   :  { %v3222_v23 = vadd.f32 %v3218_v46, %v2072_v27 }
0x24b8   :  { %v4037_v28 = vpop.f32.mrf.mxu1 }
0x24b9   :  { %4156 = vtanh.f32 %v3222_v23  ;;  %v3514_v30 = vmul.f32 -1.442695, %v3222_v23 }
0x24bb   :  { %4158 = vpow2.f32 %v3514_v30 }
0x24c6   :  { %v4157_v29 = vpop.eup %4156 }
0x24c7   :  { %3232 = vrot.lane.b32.xlu1 %v4157_v29, %s4205_s1 }
0x24c8   :  { %v4159_v31 = vpop.eup %4158 }
0x24c9   :  { %v3226_v32 = vadd.f32 1.0, %v4159_v31 }
0x24cb   :  { %4160 = vrcp.f32 %v3226_v32 }
0x24d8   :  { %v4161_v33 = vpop.eup %4160 }
0x24d9   :  { %v3230_v40 = vmul.f32 %v4161_v33, %v3140_v22 }
0x2539   :  { %v3233_v34 = vpop.permute.xlu1 %3232 }
0x253a   :  { %v3235_v36 = vmul.f32 %v4161_v33, %v3233_v34 }
0x253c   :  { %3237 = vrot.lane.b32.xlu0 %v3235_v36, %s4205_s1 }
0x25ae   :  { %v3238_v41 = vpop.permute.xlu0 %3237 }
0x25af   :  { %v3240_v50 = vadd.f32 %v3238_v41, %v3230_v40 }
0x25b1   :  { %4162 = vtanh.f32 %v3240_v50 }
0x25be   :  { %v4163_v43 = vpop.eup %4162 }
0x25bf   :  { %3243 = vrot.lane.b32.xlu1 %v4163_v43, %s4205_s1 }
0x2631   :  { %v3244_v45 = vpop.permute.xlu1 %3243 }
0x2632   :  { %v3246_v47 = vmul.f32 %v4161_v33, %v3244_v45 }
0x2634   :  { %3248 = vrot.lane.b32.xlu0 %v3246_v47, %s4204_s18 }
0x26a6   :  { %v3249_v49 = vpop.permute.xlu0 %3248 }
0x26a7   :  { %4047 = vmatmul.mubr.msk.f32.vlgmr.msra.gmra.mxu0 %vm1263_vm15, %v3249_v49 }
0x2767   :  { %v3318_v44 = vpop.f32.mrf.mxu0 }
0x2768   :  { %v3322_v18 = vadd.f32 %v3318_v44, %v2146_v51 }
0x2769   :  { %v4048_v53 = vpop.f32.mrf.mxu0 }
0x276a   :  { %4164 = vtanh.f32 %v3322_v18  ;;  %v3516_v55 = vmul.f32 -1.442695, %v3322_v18 }
0x276c   :  { %4166 = vpow2.f32 %v3516_v55 }
0x2777   :  { %v4165_v54 = vpop.eup %4164 }
0x2778   :  { %3332 = vrot.lane.b32.xlu1 %v4165_v54, %s4205_s1 }
0x2779   :  { %v4167_v56 = vpop.eup %4166 }
0x277a   :  { %v3326_v57 = vadd.f32 1.0, %v4167_v56 }
0x277c   :  { %4168 = vrcp.f32 %v3326_v57 }
0x2789   :  { %v4169_v58 = vpop.eup %4168 }
0x278a   :  { %v3330_v61 = vmul.f32 %v4169_v58, %v3240_v50 }
0x27ea   :  { %v3333_v59 = vpop.permute.xlu1 %3332 }
0x27eb   :  { %v3335_v60 = vmul.f32 %v4169_v58, %v3333_v59 }
0x27ed   :  { %3337 = vrot.lane.b32.xlu0 %v3335_v60, %s4205_s1 }
0x285f   :  { %v3338_v62 = vpop.permute.xlu0 %3337 }
0x2860   :  { %v3340_v52 = vadd.f32 %v3338_v62, %v3330_v61 }
0x2862   :  { %4170 = vtanh.f32 %v3340_v52 }
0x286f   :  { %v4171_v5 = vpop.eup %4170 }
0x2870   :  { %3343 = vrot.lane.b32.xlu1 %v4171_v5, %s4205_s1 }
0x28e2   :  { %v3344_v42 = vpop.permute.xlu1 %3343 }
0x28e3   :  { %v3346_v6 = vmul.f32 %v4169_v58, %v3344_v42 }
0x28e5   :  { %3359 = vrot.lane.b32.xlu0 %v3346_v6, %s4204_s18 }
0x2957   :  { %v3360_v7 = vpop.permute.xlu0 %3359 }
0x2958   :  { %4058 = vmatmul.mubr.msk.f32.vlgmr.msra.gmra.mxu1 %vm1263_vm15, %v3360_v7 }
0x2a18   :  { %v3429_v16 = vpop.f32.mrf.mxu1 }
0x2a19   :  { %v3430_v2 = vadd.f32 %v3517_v48, %v3429_v16 }
0x2a1a   :  { %v4059_v9 = vpop.f32.mrf.mxu1 }
0x2a1b   :  { %3434 = vst.msk [vmem:[#allocation2] sm:$0x3] %vm3433_vm0, %v3430_v2 }
0x2a1c   :  { %4183 = shalt.err (!%p4180_p4)
}
0x2a1d   :  { %3444 = dma.vmem_to_hbm [thread:$0]  %s3442_s15, 32, %s5275_s17, [#allocation3]  }
0x2a1e   :  { %4192 = dma.done.wait [#allocation3], 32  }
0x2a1f   :  { %4193 = vsyncadd [#allocation3], 4294967264 }
0x2a20   :  { %3448 = vsyncpa [#allocation3], 1 }

</bundles_post_ra>
